<compile_context>
chip_gen: v7x
topology: tpu7x:2x2x1
jax: 0.10.0
libtpu: 0.0.40
codegen_flags: <defaults>
</compile_context>

<pallas_src>
import functools
import math

import jax
import jax.numpy as jnp
from jax.experimental import pallas as pl
from jax.experimental.pallas import tpu as pltpu


# ---------------------------------------------------------------------------
# Fused decoder-layer kernel (one grid step == one batch element)
# ---------------------------------------------------------------------------

def _decoder_layer_kernel(
        dec_ref, enc_ref, sbias_ref, ebias_ref,
        wqkv_s_ref, wo_s_ref, wq_e_ref, wkv_e_ref, wo_e_ref,
        w1_ref, w2_ref,
        out_ref, sattn_ref, eattn_ref,
        *, d_k, n_heads, eps):
    scale = jnp.float32(1.0 / math.sqrt(d_k))
    d_qkv = n_heads * d_k

    def layernorm(y):
        # LayerNorm with fresh (gamma=1, beta=0) params, biased variance.
        mean = jnp.mean(y, axis=-1, keepdims=True)
        var = jnp.mean(jnp.square(y - mean), axis=-1, keepdims=True)
        return (y - mean) * jax.lax.rsqrt(var + eps)

    def attention(q, k, v, bias, attn_ref):
        # q: (Sq, H*dk), k/v: (Sk, H*dk), bias: (Sq, Sk) additive (0 / -1e9).
        ctx_parts = []
        for h in range(n_heads):                      # static unroll, H=4
            lo = h * d_k
            q_h = q[:, lo:lo + d_k]
            k_h = k[:, lo:lo + d_k]
            v_h = v[:, lo:lo + d_k]
            s = jnp.dot(q_h, k_h.T, preferred_element_type=jnp.float32)
            s = s * scale + bias
            # numerically-stable softmax over last axis
            s = s - jnp.max(s, axis=-1, keepdims=True)
            e = jnp.exp(s)
            attn = e * pl.reciprocal(jnp.sum(e, axis=-1, keepdims=True),
                                     approx=True)
            attn_ref[h, :, :] = attn                  # module returns attn
            ctx_parts.append(jnp.dot(attn, v_h,
                                     preferred_element_type=jnp.float32))
        # packed, lane-dense context (Sq, H*dk) for the output projection
        return jnp.concatenate(ctx_parts, axis=-1)

    x = dec_ref[...]            # (S_dec, D)
    enc = enc_ref[...]          # (S_enc, D)

    # ---- masked self-attention + residual + LayerNorm ----------------------
    qkv = jnp.dot(x, wqkv_s_ref[...], preferred_element_type=jnp.float32)
    ctx = attention(qkv[:, :d_qkv],
                    qkv[:, d_qkv:2 * d_qkv],
                    qkv[:, 2 * d_qkv:],
                    sbias_ref[...], sattn_ref)
    x1 = layernorm(jnp.dot(ctx, wo_s_ref[...],
                           preferred_element_type=jnp.float32) + x)

    # ---- encoder-decoder cross-attention + residual + LayerNorm ------------
    q = jnp.dot(x1, wq_e_ref[...], preferred_element_type=jnp.float32)
    kv = jnp.dot(enc, wkv_e_ref[...], preferred_element_type=jnp.float32)
    ctx = attention(q, kv[:, :d_qkv], kv[:, d_qkv:],
                    ebias_ref[...], eattn_ref)
    x2 = layernorm(jnp.dot(ctx, wo_e_ref[...],
                           preferred_element_type=jnp.float32) + x1)

    # ---- position-wise FFN + residual + LayerNorm ---------------------------
    hdn = jnp.maximum(jnp.dot(x2, w1_ref[...],
                              preferred_element_type=jnp.float32), 0.0)
    y = jnp.dot(hdn, w2_ref[...], preferred_element_type=jnp.float32) + x2
    out_ref[...] = layernorm(y)


# ---------------------------------------------------------------------------
# Wrapper
# ---------------------------------------------------------------------------

def decoder_layer(dec_inputs, enc_outputs, dec_self_attn_mask,
                  dec_enc_attn_mask, params, d_k, n_heads, eps=1e-5):
    """DecoderLayer.forward as a single fused pallas_call."""
    B, S_dec, D = dec_inputs.shape
    S_enc = enc_outputs.shape[1]
    H = n_heads

    # precompute masks as additive bias (0 keep / -1e9 masked), shared by heads
    self_bias = jnp.where(dec_self_attn_mask,
                          jnp.float32(-1e9), jnp.float32(0.0))
    enc_bias = jnp.where(dec_enc_attn_mask,
                         jnp.float32(-1e9), jnp.float32(0.0))

    def full_spec(arr):
        nd = arr.ndim
        return pl.BlockSpec(arr.shape, lambda b: (0,) * nd)

    kernel = functools.partial(_decoder_layer_kernel,
                               d_k=d_k, n_heads=H, eps=eps)

    dec_out, self_attn, enc_attn = pl.pallas_call(
        kernel,
        out_shape=(
            jax.ShapeDtypeStruct((B, S_dec, D), jnp.float32),
            jax.ShapeDtypeStruct((B, H, S_dec, S_dec), jnp.float32),
            jax.ShapeDtypeStruct((B, H, S_dec, S_enc), jnp.float32),
        ),
        grid=(B,),
        in_specs=[
            pl.BlockSpec((None, S_dec, D), lambda b: (b, 0, 0)),
            pl.BlockSpec((None, S_enc, D), lambda b: (b, 0, 0)),
            pl.BlockSpec((None, S_dec, S_dec), lambda b: (b, 0, 0)),
            pl.BlockSpec((None, S_dec, S_enc), lambda b: (b, 0, 0)),
            full_spec(params["w_qkv_self"]),
            full_spec(params["w_o_self"]),
            full_spec(params["w_q_enc"]),
            full_spec(params["w_kv_enc"]),
            full_spec(params["w_o_enc"]),
            full_spec(params["ffn_w1"]),
            full_spec(params["ffn_w2"]),
        ],
        out_specs=(
            pl.BlockSpec((None, S_dec, D), lambda b: (b, 0, 0)),
            pl.BlockSpec((None, H, S_dec, S_dec), lambda b: (b, 0, 0, 0)),
            pl.BlockSpec((None, H, S_dec, S_enc), lambda b: (b, 0, 0, 0)),
        ),
        compiler_params=pltpu.CompilerParams(
            dimension_semantics=("parallel",)),   # batch axis -> both TCs (v7x)
    )(dec_inputs, enc_outputs, self_bias, enc_bias,
      params["w_qkv_self"], params["w_o_self"],
      params["w_q_enc"], params["w_kv_enc"], params["w_o_enc"],
      params["ffn_w1"], params["ffn_w2"])

    return dec_out, self_attn, enc_attn


# ---------------------------------------------------------------------------
# Main
# ---------------------------------------------------------------------------

if __name__ == "__main__":
    # module hyper-params
    d_model, d_ff, d_k, n_heads = 32, 64, 8, 4
    B, S_dec, S_enc = 2, 8, 16

    key = jax.random.PRNGKey(0)
    keys = jax.random.split(key, 14)

    def init_w(k, shape):
        # deterministic uniform init (synthetic weights, stored as [in, out])
        bound = 1.0 / math.sqrt(shape[0])
        return jax.random.uniform(k, shape, jnp.float32, -bound, bound)

    d_qkv = d_k * n_heads
    # fused projection weights: QKV concatenated for self-attn, KV for cross
    wq_s = init_w(keys[0], (d_model, d_qkv))
    wk_s = init_w(keys[1], (d_model, d_qkv))
    wv_s = init_w(keys[2], (d_model, d_qkv))
    wq_e = init_w(keys[4], (d_model, d_qkv))
    wk_e = init_w(keys[5], (d_model, d_qkv))
    wv_e = init_w(keys[6], (d_model, d_qkv))

    params = {
        "w_qkv_self": jnp.concatenate([wq_s, wk_s, wv_s], axis=1),  # (D, 3*H*dk)
        "w_o_self":   init_w(keys[3], (d_qkv, d_model)),
        "w_q_enc":    wq_e,                                         # (D, H*dk)
        "w_kv_enc":   jnp.concatenate([wk_e, wv_e], axis=1),        # (D, 2*H*dk)
        "w_o_enc":    init_w(keys[7], (d_qkv, d_model)),
        "ffn_w1":     init_w(keys[8], (d_model, d_ff)),
        "ffn_w2":     init_w(keys[9], (d_ff, d_model)),
    }

    dec_inputs = jax.random.normal(keys[10], (B, S_dec, d_model), jnp.float32)
    enc_outputs = jax.random.normal(keys[11], (B, S_enc, d_model), jnp.float32)

    # causal self-attention mask (True == masked), like subsequence mask
    causal = jnp.triu(jnp.ones((S_dec, S_dec), jnp.bool_), k=1)
    dec_self_attn_mask = jnp.broadcast_to(causal, (B, S_dec, S_dec))
    # cross-attention padding mask: mask out the last 4 encoder positions
    pad = jnp.arange(S_enc) >= (S_enc - 4)
    dec_enc_attn_mask = jnp.broadcast_to(pad[None, None, :], (B, S_dec, S_enc))

    dec_out, self_attn, enc_attn = decoder_layer(
        dec_inputs, enc_outputs, dec_self_attn_mask, dec_enc_attn_mask,
        params, d_k, n_heads)

    jax.block_until_ready((dec_out, self_attn, enc_attn))
    assert dec_out.shape == (B, S_dec, d_model)
    assert self_attn.shape == (B, n_heads, S_dec, S_dec)
    assert enc_attn.shape == (B, n_heads, S_dec, S_enc)
    assert bool(jnp.all(jnp.isfinite(dec_out)))
    print("KERNEL_OK")
</pallas_src>

<mosaic_0001>
module attributes {stable_mosaic.version = 11 : i64} {
  func.func @_decoder_layer_kernel(%arg0: i32, %arg1: memref<1x8x32xf32, #tpu.memory_space<vmem>>, %arg2: memref<1x16x32xf32, #tpu.memory_space<vmem>>, %arg3: memref<1x8x8xf32, #tpu.memory_space<vmem>>, %arg4: memref<1x8x16xf32, #tpu.memory_space<vmem>>, %arg5: memref<32x96xf32, #tpu.memory_space<vmem>>, %arg6: memref<32x32xf32, #tpu.memory_space<vmem>>, %arg7: memref<32x32xf32, #tpu.memory_space<vmem>>, %arg8: memref<32x64xf32, #tpu.memory_space<vmem>>, %arg9: memref<32x32xf32, #tpu.memory_space<vmem>>, %arg10: memref<32x64xf32, #tpu.memory_space<vmem>>, %arg11: memref<64x32xf32, #tpu.memory_space<vmem>>, %arg12: memref<1x8x32xf32, #tpu.memory_space<vmem>>, %arg13: memref<1x4x8x8xf32, #tpu.memory_space<vmem>>, %arg14: memref<1x4x8x16xf32, #tpu.memory_space<vmem>>) attributes {dimension_semantics = [#tpu.dimension_semantics<parallel>], iteration_bounds = array<i64: 2>, scalar_prefetch = 0 : i64, scratch_operands = 0 : i64, tpu.core_type = #tpu.core_type<tc>, window_params = [{transform_indices = @transform_0, window_bounds = array<i64: 1, 8, 32>}, {transform_indices = @transform_1, window_bounds = array<i64: 1, 16, 32>}, {transform_indices = @transform_2, window_bounds = array<i64: 1, 8, 8>}, {transform_indices = @transform_3, window_bounds = array<i64: 1, 8, 16>}, {pipeline_mode = #tpu.pipeline_mode<synchronous>, transform_indices = @transform_4, window_bounds = array<i64: 32, 96>}, {pipeline_mode = #tpu.pipeline_mode<synchronous>, transform_indices = @transform_5, window_bounds = array<i64: 32, 32>}, {pipeline_mode = #tpu.pipeline_mode<synchronous>, transform_indices = @transform_6, window_bounds = array<i64: 32, 32>}, {pipeline_mode = #tpu.pipeline_mode<synchronous>, transform_indices = @transform_7, window_bounds = array<i64: 32, 64>}, {pipeline_mode = #tpu.pipeline_mode<synchronous>, transform_indices = @transform_8, window_bounds = array<i64: 32, 32>}, {pipeline_mode = #tpu.pipeline_mode<synchronous>, transform_indices = @transform_9, window_bounds = array<i64: 32, 64>}, {pipeline_mode = #tpu.pipeline_mode<synchronous>, transform_indices = @transform_10, window_bounds = array<i64: 64, 32>}, {transform_indices = @transform_11, window_bounds = array<i64: 1, 8, 32>}, {transform_indices = @transform_12, window_bounds = array<i64: 1, 4, 8, 8>}, {transform_indices = @transform_13, window_bounds = array<i64: 1, 4, 8, 16>}]} {
    %c0 = arith.constant 0 : index
    %c0_0 = arith.constant 0 : index
    %c0_1 = arith.constant 0 : index
    %0 = vector.load %arg1[%c0, %c0_0, %c0_1] : memref<1x8x32xf32, #tpu.memory_space<vmem>>, vector<1x8x32xf32>
    %1 = vector.shape_cast %0 : vector<1x8x32xf32> to vector<8x32xf32>
    %c0_2 = arith.constant 0 : index
    %c0_3 = arith.constant 0 : index
    %c0_4 = arith.constant 0 : index
    %2 = vector.load %arg2[%c0_2, %c0_3, %c0_4] : memref<1x16x32xf32, #tpu.memory_space<vmem>>, vector<1x16x32xf32>
    %3 = vector.shape_cast %2 : vector<1x16x32xf32> to vector<16x32xf32>
    %c0_5 = arith.constant 0 : index
    %c0_6 = arith.constant 0 : index
    %4 = vector.load %arg5[%c0_5, %c0_6] : memref<32x96xf32, #tpu.memory_space<vmem>>, vector<32x96xf32>
    %cst = arith.constant dense<0.000000e+00> : vector<8x96xf32>
    %5 = tpu.matmul %1, %4, %cst {dimension_numbers = #tpu.dot_dimension_numbers<[1], [0], [0], [1], [0, 0, 1, 1], [], []>} : vector<8x32xf32>, vector<32x96xf32>, vector<8x96xf32> -> vector<8x96xf32>
    %6 = vector.extract_strided_slice %5 {offsets = [0, 0], sizes = [8, 32], strides = [1, 1]} : vector<8x96xf32> to vector<8x32xf32>
    %7 = vector.extract_strided_slice %5 {offsets = [0, 32], sizes = [8, 32], strides = [1, 1]} : vector<8x96xf32> to vector<8x32xf32>
    %8 = vector.extract_strided_slice %5 {offsets = [0, 64], sizes = [8, 32], strides = [1, 1]} : vector<8x96xf32> to vector<8x32xf32>
    %c0_7 = arith.constant 0 : index
    %c0_8 = arith.constant 0 : index
    %c0_9 = arith.constant 0 : index
    %9 = vector.load %arg3[%c0_7, %c0_8, %c0_9] : memref<1x8x8xf32, #tpu.memory_space<vmem>>, vector<1x8x8xf32>
    %10 = vector.shape_cast %9 : vector<1x8x8xf32> to vector<8x8xf32>
    %11 = vector.extract_strided_slice %6 {offsets = [0, 0], sizes = [8, 8], strides = [1, 1]} : vector<8x32xf32> to vector<8x8xf32>
    %12 = vector.extract_strided_slice %7 {offsets = [0, 0], sizes = [8, 8], strides = [1, 1]} : vector<8x32xf32> to vector<8x8xf32>
    %13 = vector.extract_strided_slice %8 {offsets = [0, 0], sizes = [8, 8], strides = [1, 1]} : vector<8x32xf32> to vector<8x8xf32>
    %14 = tpu.transpose %12, [1, 0] : vector<8x8xf32> -> vector<8x8xf32>
    %cst_10 = arith.constant dense<0.000000e+00> : vector<8x8xf32>
    %15 = tpu.matmul %11, %14, %cst_10 {dimension_numbers = #tpu.dot_dimension_numbers<[1], [0], [0], [1], [0, 0, 1, 1], [], []>} : vector<8x8xf32>, vector<8x8xf32>, vector<8x8xf32> -> vector<8x8xf32>
    %cst_11 = arith.constant 0.353553385 : f32
    %16 = vector.broadcast %cst_11 : f32 to vector<8x8xf32>
    %17 = arith.mulf %15, %16 : vector<8x8xf32>
    %18 = arith.addf %17, %10 : vector<8x8xf32>
    %cst_12 = arith.constant dense<0xFF800000> : vector<8xf32>
    %19 = vector.multi_reduction <maximumf>, %18, %cst_12 [1] : vector<8x8xf32> to vector<8xf32>
    %20 = vector.shape_cast %19 : vector<8xf32> to vector<8x1xf32>
    %21 = vector.broadcast %20 : vector<8x1xf32> to vector<8x8xf32>
    %22 = arith.subf %18, %21 : vector<8x8xf32>
    %23 = math.exp %22 : vector<8x8xf32>
    %cst_13 = arith.constant dense<0.000000e+00> : vector<8xf32>
    %24 = vector.multi_reduction <add>, %23, %cst_13 [1] : vector<8x8xf32> to vector<8xf32>
    %25 = vector.shape_cast %24 : vector<8xf32> to vector<8x1xf32>
    %26 = tpu.reciprocal %25 {approx = true} : vector<8x1xf32> -> vector<8x1xf32>
    %27 = vector.broadcast %26 : vector<8x1xf32> to vector<8x8xf32>
    %28 = arith.mulf %23, %27 : vector<8x8xf32>
    %c0_14 = arith.constant 0 : index
    %c0_15 = arith.constant 0 : index
    %c0_16 = arith.constant 0 : index
    %c0_17 = arith.constant 0 : index
    %29 = vector.load %arg13[%c0_14, %c0_15, %c0_16, %c0_17] : memref<1x4x8x8xf32, #tpu.memory_space<vmem>>, vector<1x1x8x8xf32>
    %30 = vector.shape_cast %29 : vector<1x1x8x8xf32> to vector<8x8xf32>
    %31 = vector.shape_cast %28 : vector<8x8xf32> to vector<1x1x8x8xf32>
    tpu.vector_store %arg13[%c0_14, %c0_15, %c0_16, %c0_17], %31 {strides = array<i32>} : memref<1x4x8x8xf32, #tpu.memory_space<vmem>>, vector<1x1x8x8xf32>,
    %cst_18 = arith.constant dense<0.000000e+00> : vector<8x8xf32>
    %32 = tpu.matmul %28, %13, %cst_18 {dimension_numbers = #tpu.dot_dimension_numbers<[1], [0], [0], [1], [0, 0, 1, 1], [], []>} : vector<8x8xf32>, vector<8x8xf32>, vector<8x8xf32> -> vector<8x8xf32>
    %33 = vector.extract_strided_slice %6 {offsets = [0, 8], sizes = [8, 8], strides = [1, 1]} : vector<8x32xf32> to vector<8x8xf32>
    %34 = vector.extract_strided_slice %7 {offsets = [0, 8], sizes = [8, 8], strides = [1, 1]} : vector<8x32xf32> to vector<8x8xf32>
    %35 = vector.extract_strided_slice %8 {offsets = [0, 8], sizes = [8, 8], strides = [1, 1]} : vector<8x32xf32> to vector<8x8xf32>
    %36 = tpu.transpose %34, [1, 0] : vector<8x8xf32> -> vector<8x8xf32>
    %cst_19 = arith.constant dense<0.000000e+00> : vector<8x8xf32>
    %37 = tpu.matmul %33, %36, %cst_19 {dimension_numbers = #tpu.dot_dimension_numbers<[1], [0], [0], [1], [0, 0, 1, 1], [], []>} : vector<8x8xf32>, vector<8x8xf32>, vector<8x8xf32> -> vector<8x8xf32>
    %cst_20 = arith.constant 0.353553385 : f32
    %38 = vector.broadcast %cst_20 : f32 to vector<8x8xf32>
    %39 = arith.mulf %37, %38 : vector<8x8xf32>
    %40 = arith.addf %39, %10 : vector<8x8xf32>
    %cst_21 = arith.constant dense<0xFF800000> : vector<8xf32>
    %41 = vector.multi_reduction <maximumf>, %40, %cst_21 [1] : vector<8x8xf32> to vector<8xf32>
    %42 = vector.shape_cast %41 : vector<8xf32> to vector<8x1xf32>
    %43 = vector.broadcast %42 : vector<8x1xf32> to vector<8x8xf32>
    %44 = arith.subf %40, %43 : vector<8x8xf32>
    %45 = math.exp %44 : vector<8x8xf32>
    %cst_22 = arith.constant dense<0.000000e+00> : vector<8xf32>
    %46 = vector.multi_reduction <add>, %45, %cst_22 [1] : vector<8x8xf32> to vector<8xf32>
    %47 = vector.shape_cast %46 : vector<8xf32> to vector<8x1xf32>
    %48 = tpu.reciprocal %47 {approx = true} : vector<8x1xf32> -> vector<8x1xf32>
    %49 = vector.broadcast %48 : vector<8x1xf32> to vector<8x8xf32>
    %50 = arith.mulf %45, %49 : vector<8x8xf32>
    %c0_23 = arith.constant 0 : index
    %c1 = arith.constant 1 : index
    %c0_24 = arith.constant 0 : index
    %c0_25 = arith.constant 0 : index
    %51 = vector.load %arg13[%c0_23, %c1, %c0_24, %c0_25] : memref<1x4x8x8xf32, #tpu.memory_space<vmem>>, vector<1x1x8x8xf32>
    %52 = vector.shape_cast %51 : vector<1x1x8x8xf32> to vector<8x8xf32>
    %53 = vector.shape_cast %50 : vector<8x8xf32> to vector<1x1x8x8xf32>
    tpu.vector_store %arg13[%c0_23, %c1, %c0_24, %c0_25], %53 {strides = array<i32>} : memref<1x4x8x8xf32, #tpu.memory_space<vmem>>, vector<1x1x8x8xf32>,
    %cst_26 = arith.constant dense<0.000000e+00> : vector<8x8xf32>
    %54 = tpu.matmul %50, %35, %cst_26 {dimension_numbers = #tpu.dot_dimension_numbers<[1], [0], [0], [1], [0, 0, 1, 1], [], []>} : vector<8x8xf32>, vector<8x8xf32>, vector<8x8xf32> -> vector<8x8xf32>
    %55 = vector.extract_strided_slice %6 {offsets = [0, 16], sizes = [8, 8], strides = [1, 1]} : vector<8x32xf32> to vector<8x8xf32>
    %56 = vector.extract_strided_slice %7 {offsets = [0, 16], sizes = [8, 8], strides = [1, 1]} : vector<8x32xf32> to vector<8x8xf32>
    %57 = vector.extract_strided_slice %8 {offsets = [0, 16], sizes = [8, 8], strides = [1, 1]} : vector<8x32xf32> to vector<8x8xf32>
    %58 = tpu.transpose %56, [1, 0] : vector<8x8xf32> -> vector<8x8xf32>
    %cst_27 = arith.constant dense<0.000000e+00> : vector<8x8xf32>
    %59 = tpu.matmul %55, %58, %cst_27 {dimension_numbers = #tpu.dot_dimension_numbers<[1], [0], [0], [1], [0, 0, 1, 1], [], []>} : vector<8x8xf32>, vector<8x8xf32>, vector<8x8xf32> -> vector<8x8xf32>
    %cst_28 = arith.constant 0.353553385 : f32
    %60 = vector.broadcast %cst_28 : f32 to vector<8x8xf32>
    %61 = arith.mulf %59, %60 : vector<8x8xf32>
    %62 = arith.addf %61, %10 : vector<8x8xf32>
    %cst_29 = arith.constant dense<0xFF800000> : vector<8xf32>
    %63 = vector.multi_reduction <maximumf>, %62, %cst_29 [1] : vector<8x8xf32> to vector<8xf32>
    %64 = vector.shape_cast %63 : vector<8xf32> to vector<8x1xf32>
    %65 = vector.broadcast %64 : vector<8x1xf32> to vector<8x8xf32>
    %66 = arith.subf %62, %65 : vector<8x8xf32>
    %67 = math.exp %66 : vector<8x8xf32>
    %cst_30 = arith.constant dense<0.000000e+00> : vector<8xf32>
    %68 = vector.multi_reduction <add>, %67, %cst_30 [1] : vector<8x8xf32> to vector<8xf32>
    %69 = vector.shape_cast %68 : vector<8xf32> to vector<8x1xf32>
    %70 = tpu.reciprocal %69 {approx = true} : vector<8x1xf32> -> vector<8x1xf32>
    %71 = vector.broadcast %70 : vector<8x1xf32> to vector<8x8xf32>
    %72 = arith.mulf %67, %71 : vector<8x8xf32>
    %c0_31 = arith.constant 0 : index
    %c2 = arith.constant 2 : index
    %c0_32 = arith.constant 0 : index
    %c0_33 = arith.constant 0 : index
    %73 = vector.load %arg13[%c0_31, %c2, %c0_32, %c0_33] : memref<1x4x8x8xf32, #tpu.memory_space<vmem>>, vector<1x1x8x8xf32>
    %74 = vector.shape_cast %73 : vector<1x1x8x8xf32> to vector<8x8xf32>
    %75 = vector.shape_cast %72 : vector<8x8xf32> to vector<1x1x8x8xf32>
    tpu.vector_store %arg13[%c0_31, %c2, %c0_32, %c0_33], %75 {strides = array<i32>} : memref<1x4x8x8xf32, #tpu.memory_space<vmem>>, vector<1x1x8x8xf32>,
    %cst_34 = arith.constant dense<0.000000e+00> : vector<8x8xf32>
    %76 = tpu.matmul %72, %57, %cst_34 {dimension_numbers = #tpu.dot_dimension_numbers<[1], [0], [0], [1], [0, 0, 1, 1], [], []>} : vector<8x8xf32>, vector<8x8xf32>, vector<8x8xf32> -> vector<8x8xf32>
    %77 = vector.extract_strided_slice %6 {offsets = [0, 24], sizes = [8, 8], strides = [1, 1]} : vector<8x32xf32> to vector<8x8xf32>
    %78 = vector.extract_strided_slice %7 {offsets = [0, 24], sizes = [8, 8], strides = [1, 1]} : vector<8x32xf32> to vector<8x8xf32>
    %79 = vector.extract_strided_slice %8 {offsets = [0, 24], sizes = [8, 8], strides = [1, 1]} : vector<8x32xf32> to vector<8x8xf32>
    %80 = tpu.transpose %78, [1, 0] : vector<8x8xf32> -> vector<8x8xf32>
    %cst_35 = arith.constant dense<0.000000e+00> : vector<8x8xf32>
    %81 = tpu.matmul %77, %80, %cst_35 {dimension_numbers = #tpu.dot_dimension_numbers<[1], [0], [0], [1], [0, 0, 1, 1], [], []>} : vector<8x8xf32>, vector<8x8xf32>, vector<8x8xf32> -> vector<8x8xf32>
    %cst_36 = arith.constant 0.353553385 : f32
    %82 = vector.broadcast %cst_36 : f32 to vector<8x8xf32>
    %83 = arith.mulf %81, %82 : vector<8x8xf32>
    %84 = arith.addf %83, %10 : vector<8x8xf32>
    %cst_37 = arith.constant dense<0xFF800000> : vector<8xf32>
    %85 = vector.multi_reduction <maximumf>, %84, %cst_37 [1] : vector<8x8xf32> to vector<8xf32>
    %86 = vector.shape_cast %85 : vector<8xf32> to vector<8x1xf32>
    %87 = vector.broadcast %86 : vector<8x1xf32> to vector<8x8xf32>
    %88 = arith.subf %84, %87 : vector<8x8xf32>
    %89 = math.exp %88 : vector<8x8xf32>
    %cst_38 = arith.constant dense<0.000000e+00> : vector<8xf32>
    %90 = vector.multi_reduction <add>, %89, %cst_38 [1] : vector<8x8xf32> to vector<8xf32>
    %91 = vector.shape_cast %90 : vector<8xf32> to vector<8x1xf32>
    %92 = tpu.reciprocal %91 {approx = true} : vector<8x1xf32> -> vector<8x1xf32>
    %93 = vector.broadcast %92 : vector<8x1xf32> to vector<8x8xf32>
    %94 = arith.mulf %89, %93 : vector<8x8xf32>
    %c0_39 = arith.constant 0 : index
    %c3 = arith.constant 3 : index
    %c0_40 = arith.constant 0 : index
    %c0_41 = arith.constant 0 : index
    %95 = vector.load %arg13[%c0_39, %c3, %c0_40, %c0_41] : memref<1x4x8x8xf32, #tpu.memory_space<vmem>>, vector<1x1x8x8xf32>
    %96 = vector.shape_cast %95 : vector<1x1x8x8xf32> to vector<8x8xf32>
    %97 = vector.shape_cast %94 : vector<8x8xf32> to vector<1x1x8x8xf32>
    tpu.vector_store %arg13[%c0_39, %c3, %c0_40, %c0_41], %97 {strides = array<i32>} : memref<1x4x8x8xf32, #tpu.memory_space<vmem>>, vector<1x1x8x8xf32>,
    %cst_42 = arith.constant dense<0.000000e+00> : vector<8x8xf32>
    %98 = tpu.matmul %94, %79, %cst_42 {dimension_numbers = #tpu.dot_dimension_numbers<[1], [0], [0], [1], [0, 0, 1, 1], [], []>} : vector<8x8xf32>, vector<8x8xf32>, vector<8x8xf32> -> vector<8x8xf32>
    %99 = tpu.concatenate %32, %54, %76, %98 in 1 : vector<8x8xf32>, vector<8x8xf32>, vector<8x8xf32>, vector<8x8xf32> -> vector<8x32xf32>
    %c0_43 = arith.constant 0 : index
    %c0_44 = arith.constant 0 : index
    %100 = vector.load %arg6[%c0_43, %c0_44] : memref<32x32xf32, #tpu.memory_space<vmem>>, vector<32x32xf32>
    %cst_45 = arith.constant dense<0.000000e+00> : vector<8x32xf32>
    %101 = tpu.matmul %99, %100, %cst_45 {dimension_numbers = #tpu.dot_dimension_numbers<[1], [0], [0], [1], [0, 0, 1, 1], [], []>} : vector<8x32xf32>, vector<32x32xf32>, vector<8x32xf32> -> vector<8x32xf32>
    %102 = arith.addf %101, %1 : vector<8x32xf32>
    %cst_46 = arith.constant dense<0.000000e+00> : vector<8xf32>
    %103 = vector.multi_reduction <add>, %102, %cst_46 [1] : vector<8x32xf32> to vector<8xf32>
    %104 = vector.shape_cast %103 : vector<8xf32> to vector<8x1xf32>
    %cst_47 = arith.constant 3.200000e+01 : f32
    %105 = vector.broadcast %cst_47 : f32 to vector<8x1xf32>
    %106 = arith.divf %104, %105 : vector<8x1xf32>
    %107 = vector.broadcast %106 : vector<8x1xf32> to vector<8x32xf32>
    %108 = arith.subf %102, %107 : vector<8x32xf32>
    %109 = arith.mulf %108, %108 : vector<8x32xf32>
    %cst_48 = arith.constant dense<0.000000e+00> : vector<8xf32>
    %110 = vector.multi_reduction <add>, %109, %cst_48 [1] : vector<8x32xf32> to vector<8xf32>
    %111 = vector.shape_cast %110 : vector<8xf32> to vector<8x1xf32>
    %cst_49 = arith.constant 3.200000e+01 : f32
    %112 = vector.broadcast %cst_49 : f32 to vector<8x1xf32>
    %113 = arith.divf %111, %112 : vector<8x1xf32>
    %114 = vector.broadcast %106 : vector<8x1xf32> to vector<8x32xf32>
    %115 = arith.subf %102, %114 : vector<8x32xf32>
    %cst_50 = arith.constant 9.99999974E-6 : f32
    %116 = vector.broadcast %cst_50 : f32 to vector<8x1xf32>
    %117 = arith.addf %113, %116 : vector<8x1xf32>
    %118 = math.rsqrt %117 : vector<8x1xf32>
    %119 = vector.broadcast %118 : vector<8x1xf32> to vector<8x32xf32>
    %120 = arith.mulf %115, %119 : vector<8x32xf32>
    %c0_51 = arith.constant 0 : index
    %c0_52 = arith.constant 0 : index
    %121 = vector.load %arg7[%c0_51, %c0_52] : memref<32x32xf32, #tpu.memory_space<vmem>>, vector<32x32xf32>
    %cst_53 = arith.constant dense<0.000000e+00> : vector<8x32xf32>
    %122 = tpu.matmul %120, %121, %cst_53 {dimension_numbers = #tpu.dot_dimension_numbers<[1], [0], [0], [1], [0, 0, 1, 1], [], []>} : vector<8x32xf32>, vector<32x32xf32>, vector<8x32xf32> -> vector<8x32xf32>
    %c0_54 = arith.constant 0 : index
    %c0_55 = arith.constant 0 : index
    %123 = vector.load %arg8[%c0_54, %c0_55] : memref<32x64xf32, #tpu.memory_space<vmem>>, vector<32x64xf32>
    %cst_56 = arith.constant dense<0.000000e+00> : vector<16x64xf32>
    %124 = tpu.matmul %3, %123, %cst_56 {dimension_numbers = #tpu.dot_dimension_numbers<[1], [0], [0], [1], [0, 0, 1, 1], [], []>} : vector<16x32xf32>, vector<32x64xf32>, vector<16x64xf32> -> vector<16x64xf32>
    %125 = vector.extract_strided_slice %124 {offsets = [0, 0], sizes = [16, 32], strides = [1, 1]} : vector<16x64xf32> to vector<16x32xf32>
    %126 = vector.extract_strided_slice %124 {offsets = [0, 32], sizes = [16, 32], strides = [1, 1]} : vector<16x64xf32> to vector<16x32xf32>
    %c0_57 = arith.constant 0 : index
    %c0_58 = arith.constant 0 : index
    %c0_59 = arith.constant 0 : index
    %127 = vector.load %arg4[%c0_57, %c0_58, %c0_59] : memref<1x8x16xf32, #tpu.memory_space<vmem>>, vector<1x8x16xf32>
    %128 = vector.shape_cast %127 : vector<1x8x16xf32> to vector<8x16xf32>
    %129 = vector.extract_strided_slice %122 {offsets = [0, 0], sizes = [8, 8], strides = [1, 1]} : vector<8x32xf32> to vector<8x8xf32>
    %130 = vector.extract_strided_slice %125 {offsets = [0, 0], sizes = [16, 8], strides = [1, 1]} : vector<16x32xf32> to vector<16x8xf32>
    %131 = vector.extract_strided_slice %126 {offsets = [0, 0], sizes = [16, 8], strides = [1, 1]} : vector<16x32xf32> to vector<16x8xf32>
    %132 = tpu.transpose %130, [1, 0] : vector<16x8xf32> -> vector<8x16xf32>
    %cst_60 = arith.constant dense<0.000000e+00> : vector<8x16xf32>
    %133 = tpu.matmul %129, %132, %cst_60 {dimension_numbers = #tpu.dot_dimension_numbers<[1], [0], [0], [1], [0, 0, 1, 1], [], []>} : vector<8x8xf32>, vector<8x16xf32>, vector<8x16xf32> -> vector<8x16xf32>
    %cst_61 = arith.constant 0.353553385 : f32
    %134 = vector.broadcast %cst_61 : f32 to vector<8x16xf32>
    %135 = arith.mulf %133, %134 : vector<8x16xf32>
    %136 = arith.addf %135, %128 : vector<8x16xf32>
    %cst_62 = arith.constant dense<0xFF800000> : vector<8xf32>
    %137 = vector.multi_reduction <maximumf>, %136, %cst_62 [1] : vector<8x16xf32> to vector<8xf32>
    %138 = vector.shape_cast %137 : vector<8xf32> to vector<8x1xf32>
    %139 = vector.broadcast %138 : vector<8x1xf32> to vector<8x16xf32>
    %140 = arith.subf %136, %139 : vector<8x16xf32>
    %141 = math.exp %140 : vector<8x16xf32>
    %cst_63 = arith.constant dense<0.000000e+00> : vector<8xf32>
    %142 = vector.multi_reduction <add>, %141, %cst_63 [1] : vector<8x16xf32> to vector<8xf32>
    %143 = vector.shape_cast %142 : vector<8xf32> to vector<8x1xf32>
    %144 = tpu.reciprocal %143 {approx = true} : vector<8x1xf32> -> vector<8x1xf32>
    %145 = vector.broadcast %144 : vector<8x1xf32> to vector<8x16xf32>
    %146 = arith.mulf %141, %145 : vector<8x16xf32>
    %c0_64 = arith.constant 0 : index
    %c0_65 = arith.constant 0 : index
    %c0_66 = arith.constant 0 : index
    %c0_67 = arith.constant 0 : index
    %147 = vector.load %arg14[%c0_64, %c0_65, %c0_66, %c0_67] : memref<1x4x8x16xf32, #tpu.memory_space<vmem>>, vector<1x1x8x16xf32>
    %148 = vector.shape_cast %147 : vector<1x1x8x16xf32> to vector<8x16xf32>
    %149 = vector.shape_cast %146 : vector<8x16xf32> to vector<1x1x8x16xf32>
    tpu.vector_store %arg14[%c0_64, %c0_65, %c0_66, %c0_67], %149 {strides = array<i32>} : memref<1x4x8x16xf32, #tpu.memory_space<vmem>>, vector<1x1x8x16xf32>,
    %cst_68 = arith.constant dense<0.000000e+00> : vector<8x8xf32>
    %150 = tpu.matmul %146, %131, %cst_68 {dimension_numbers = #tpu.dot_dimension_numbers<[1], [0], [0], [1], [0, 0, 1, 1], [], []>} : vector<8x16xf32>, vector<16x8xf32>, vector<8x8xf32> -> vector<8x8xf32>
    %151 = vector.extract_strided_slice %122 {offsets = [0, 8], sizes = [8, 8], strides = [1, 1]} : vector<8x32xf32> to vector<8x8xf32>
    %152 = vector.extract_strided_slice %125 {offsets = [0, 8], sizes = [16, 8], strides = [1, 1]} : vector<16x32xf32> to vector<16x8xf32>
    %153 = vector.extract_strided_slice %126 {offsets = [0, 8], sizes = [16, 8], strides = [1, 1]} : vector<16x32xf32> to vector<16x8xf32>
    %154 = tpu.transpose %152, [1, 0] : vector<16x8xf32> -> vector<8x16xf32>
    %cst_69 = arith.constant dense<0.000000e+00> : vector<8x16xf32>
    %155 = tpu.matmul %151, %154, %cst_69 {dimension_numbers = #tpu.dot_dimension_numbers<[1], [0], [0], [1], [0, 0, 1, 1], [], []>} : vector<8x8xf32>, vector<8x16xf32>, vector<8x16xf32> -> vector<8x16xf32>
    %cst_70 = arith.constant 0.353553385 : f32
    %156 = vector.broadcast %cst_70 : f32 to vector<8x16xf32>
    %157 = arith.mulf %155, %156 : vector<8x16xf32>
    %158 = arith.addf %157, %128 : vector<8x16xf32>
    %cst_71 = arith.constant dense<0xFF800000> : vector<8xf32>
    %159 = vector.multi_reduction <maximumf>, %158, %cst_71 [1] : vector<8x16xf32> to vector<8xf32>
    %160 = vector.shape_cast %159 : vector<8xf32> to vector<8x1xf32>
    %161 = vector.broadcast %160 : vector<8x1xf32> to vector<8x16xf32>
    %162 = arith.subf %158, %161 : vector<8x16xf32>
    %163 = math.exp %162 : vector<8x16xf32>
    %cst_72 = arith.constant dense<0.000000e+00> : vector<8xf32>
    %164 = vector.multi_reduction <add>, %163, %cst_72 [1] : vector<8x16xf32> to vector<8xf32>
    %165 = vector.shape_cast %164 : vector<8xf32> to vector<8x1xf32>
    %166 = tpu.reciprocal %165 {approx = true} : vector<8x1xf32> -> vector<8x1xf32>
    %167 = vector.broadcast %166 : vector<8x1xf32> to vector<8x16xf32>
    %168 = arith.mulf %163, %167 : vector<8x16xf32>
    %c0_73 = arith.constant 0 : index
    %c1_74 = arith.constant 1 : index
    %c0_75 = arith.constant 0 : index
    %c0_76 = arith.constant 0 : index
    %169 = vector.load %arg14[%c0_73, %c1_74, %c0_75, %c0_76] : memref<1x4x8x16xf32, #tpu.memory_space<vmem>>, vector<1x1x8x16xf32>
    %170 = vector.shape_cast %169 : vector<1x1x8x16xf32> to vector<8x16xf32>
    %171 = vector.shape_cast %168 : vector<8x16xf32> to vector<1x1x8x16xf32>
    tpu.vector_store %arg14[%c0_73, %c1_74, %c0_75, %c0_76], %171 {strides = array<i32>} : memref<1x4x8x16xf32, #tpu.memory_space<vmem>>, vector<1x1x8x16xf32>,
    %cst_77 = arith.constant dense<0.000000e+00> : vector<8x8xf32>
    %172 = tpu.matmul %168, %153, %cst_77 {dimension_numbers = #tpu.dot_dimension_numbers<[1], [0], [0], [1], [0, 0, 1, 1], [], []>} : vector<8x16xf32>, vector<16x8xf32>, vector<8x8xf32> -> vector<8x8xf32>
    %173 = vector.extract_strided_slice %122 {offsets = [0, 16], sizes = [8, 8], strides = [1, 1]} : vector<8x32xf32> to vector<8x8xf32>
    %174 = vector.extract_strided_slice %125 {offsets = [0, 16], sizes = [16, 8], strides = [1, 1]} : vector<16x32xf32> to vector<16x8xf32>
    %175 = vector.extract_strided_slice %126 {offsets = [0, 16], sizes = [16, 8], strides = [1, 1]} : vector<16x32xf32> to vector<16x8xf32>
    %176 = tpu.transpose %174, [1, 0] : vector<16x8xf32> -> vector<8x16xf32>
    %cst_78 = arith.constant dense<0.000000e+00> : vector<8x16xf32>
    %177 = tpu.matmul %173, %176, %cst_78 {dimension_numbers = #tpu.dot_dimension_numbers<[1], [0], [0], [1], [0, 0, 1, 1], [], []>} : vector<8x8xf32>, vector<8x16xf32>, vector<8x16xf32> -> vector<8x16xf32>
    %cst_79 = arith.constant 0.353553385 : f32
    %178 = vector.broadcast %cst_79 : f32 to vector<8x16xf32>
    %179 = arith.mulf %177, %178 : vector<8x16xf32>
    %180 = arith.addf %179, %128 : vector<8x16xf32>
    %cst_80 = arith.constant dense<0xFF800000> : vector<8xf32>
    %181 = vector.multi_reduction <maximumf>, %180, %cst_80 [1] : vector<8x16xf32> to vector<8xf32>
    %182 = vector.shape_cast %181 : vector<8xf32> to vector<8x1xf32>
    %183 = vector.broadcast %182 : vector<8x1xf32> to vector<8x16xf32>
    %184 = arith.subf %180, %183 : vector<8x16xf32>
    %185 = math.exp %184 : vector<8x16xf32>
    %cst_81 = arith.constant dense<0.000000e+00> : vector<8xf32>
    %186 = vector.multi_reduction <add>, %185, %cst_81 [1] : vector<8x16xf32> to vector<8xf32>
    %187 = vector.shape_cast %186 : vector<8xf32> to vector<8x1xf32>
    %188 = tpu.reciprocal %187 {approx = true} : vector<8x1xf32> -> vector<8x1xf32>
    %189 = vector.broadcast %188 : vector<8x1xf32> to vector<8x16xf32>
    %190 = arith.mulf %185, %189 : vector<8x16xf32>
    %c0_82 = arith.constant 0 : index
    %c2_83 = arith.constant 2 : index
    %c0_84 = arith.constant 0 : index
    %c0_85 = arith.constant 0 : index
    %191 = vector.load %arg14[%c0_82, %c2_83, %c0_84, %c0_85] : memref<1x4x8x16xf32, #tpu.memory_space<vmem>>, vector<1x1x8x16xf32>
    %192 = vector.shape_cast %191 : vector<1x1x8x16xf32> to vector<8x16xf32>
    %193 = vector.shape_cast %190 : vector<8x16xf32> to vector<1x1x8x16xf32>
    tpu.vector_store %arg14[%c0_82, %c2_83, %c0_84, %c0_85], %193 {strides = array<i32>} : memref<1x4x8x16xf32, #tpu.memory_space<vmem>>, vector<1x1x8x16xf32>,
    %cst_86 = arith.constant dense<0.000000e+00> : vector<8x8xf32>
    %194 = tpu.matmul %190, %175, %cst_86 {dimension_numbers = #tpu.dot_dimension_numbers<[1], [0], [0], [1], [0, 0, 1, 1], [], []>} : vector<8x16xf32>, vector<16x8xf32>, vector<8x8xf32> -> vector<8x8xf32>
    %195 = vector.extract_strided_slice %122 {offsets = [0, 24], sizes = [8, 8], strides = [1, 1]} : vector<8x32xf32> to vector<8x8xf32>
    %196 = vector.extract_strided_slice %125 {offsets = [0, 24], sizes = [16, 8], strides = [1, 1]} : vector<16x32xf32> to vector<16x8xf32>
    %197 = vector.extract_strided_slice %126 {offsets = [0, 24], sizes = [16, 8], strides = [1, 1]} : vector<16x32xf32> to vector<16x8xf32>
    %198 = tpu.transpose %196, [1, 0] : vector<16x8xf32> -> vector<8x16xf32>
    %cst_87 = arith.constant dense<0.000000e+00> : vector<8x16xf32>
    %199 = tpu.matmul %195, %198, %cst_87 {dimension_numbers = #tpu.dot_dimension_numbers<[1], [0], [0], [1], [0, 0, 1, 1], [], []>} : vector<8x8xf32>, vector<8x16xf32>, vector<8x16xf32> -> vector<8x16xf32>
    %cst_88 = arith.constant 0.353553385 : f32
    %200 = vector.broadcast %cst_88 : f32 to vector<8x16xf32>
    %201 = arith.mulf %199, %200 : vector<8x16xf32>
    %202 = arith.addf %201, %128 : vector<8x16xf32>
    %cst_89 = arith.constant dense<0xFF800000> : vector<8xf32>
    %203 = vector.multi_reduction <maximumf>, %202, %cst_89 [1] : vector<8x16xf32> to vector<8xf32>
    %204 = vector.shape_cast %203 : vector<8xf32> to vector<8x1xf32>
    %205 = vector.broadcast %204 : vector<8x1xf32> to vector<8x16xf32>
    %206 = arith.subf %202, %205 : vector<8x16xf32>
    %207 = math.exp %206 : vector<8x16xf32>
    %cst_90 = arith.constant dense<0.000000e+00> : vector<8xf32>
    %208 = vector.multi_reduction <add>, %207, %cst_90 [1] : vector<8x16xf32> to vector<8xf32>
    %209 = vector.shape_cast %208 : vector<8xf32> to vector<8x1xf32>
    %210 = tpu.reciprocal %209 {approx = true} : vector<8x1xf32> -> vector<8x1xf32>
    %211 = vector.broadcast %210 : vector<8x1xf32> to vector<8x16xf32>
    %212 = arith.mulf %207, %211 : vector<8x16xf32>
    %c0_91 = arith.constant 0 : index
    %c3_92 = arith.constant 3 : index
    %c0_93 = arith.constant 0 : index
    %c0_94 = arith.constant 0 : index
    %213 = vector.load %arg14[%c0_91, %c3_92, %c0_93, %c0_94] : memref<1x4x8x16xf32, #tpu.memory_space<vmem>>, vector<1x1x8x16xf32>
    %214 = vector.shape_cast %213 : vector<1x1x8x16xf32> to vector<8x16xf32>
    %215 = vector.shape_cast %212 : vector<8x16xf32> to vector<1x1x8x16xf32>
    tpu.vector_store %arg14[%c0_91, %c3_92, %c0_93, %c0_94], %215 {strides = array<i32>} : memref<1x4x8x16xf32, #tpu.memory_space<vmem>>, vector<1x1x8x16xf32>,
    %cst_95 = arith.constant dense<0.000000e+00> : vector<8x8xf32>
    %216 = tpu.matmul %212, %197, %cst_95 {dimension_numbers = #tpu.dot_dimension_numbers<[1], [0], [0], [1], [0, 0, 1, 1], [], []>} : vector<8x16xf32>, vector<16x8xf32>, vector<8x8xf32> -> vector<8x8xf32>
    %217 = tpu.concatenate %150, %172, %194, %216 in 1 : vector<8x8xf32>, vector<8x8xf32>, vector<8x8xf32>, vector<8x8xf32> -> vector<8x32xf32>
    %c0_96 = arith.constant 0 : index
    %c0_97 = arith.constant 0 : index
    %218 = vector.load %arg9[%c0_96, %c0_97] : memref<32x32xf32, #tpu.memory_space<vmem>>, vector<32x32xf32>
    %cst_98 = arith.constant dense<0.000000e+00> : vector<8x32xf32>
    %219 = tpu.matmul %217, %218, %cst_98 {dimension_numbers = #tpu.dot_dimension_numbers<[1], [0], [0], [1], [0, 0, 1, 1], [], []>} : vector<8x32xf32>, vector<32x32xf32>, vector<8x32xf32> -> vector<8x32xf32>
    %220 = arith.addf %219, %120 : vector<8x32xf32>
    %cst_99 = arith.constant dense<0.000000e+00> : vector<8xf32>
    %221 = vector.multi_reduction <add>, %220, %cst_99 [1] : vector<8x32xf32> to vector<8xf32>
    %222 = vector.shape_cast %221 : vector<8xf32> to vector<8x1xf32>
    %cst_100 = arith.constant 3.200000e+01 : f32
    %223 = vector.broadcast %cst_100 : f32 to vector<8x1xf32>
    %224 = arith.divf %222, %223 : vector<8x1xf32>
    %225 = vector.broadcast %224 : vector<8x1xf32> to vector<8x32xf32>
    %226 = arith.subf %220, %225 : vector<8x32xf32>
    %227 = arith.mulf %226, %226 : vector<8x32xf32>
    %cst_101 = arith.constant dense<0.000000e+00> : vector<8xf32>
    %228 = vector.multi_reduction <add>, %227, %cst_101 [1] : vector<8x32xf32> to vector<8xf32>
    %229 = vector.shape_cast %228 : vector<8xf32> to vector<8x1xf32>
    %cst_102 = arith.constant 3.200000e+01 : f32
    %230 = vector.broadcast %cst_102 : f32 to vector<8x1xf32>
    %231 = arith.divf %229, %230 : vector<8x1xf32>
    %232 = vector.broadcast %224 : vector<8x1xf32> to vector<8x32xf32>
    %233 = arith.subf %220, %232 : vector<8x32xf32>
    %cst_103 = arith.constant 9.99999974E-6 : f32
    %234 = vector.broadcast %cst_103 : f32 to vector<8x1xf32>
    %235 = arith.addf %231, %234 : vector<8x1xf32>
    %236 = math.rsqrt %235 : vector<8x1xf32>
    %237 = vector.broadcast %236 : vector<8x1xf32> to vector<8x32xf32>
    %238 = arith.mulf %233, %237 : vector<8x32xf32>
    %c0_104 = arith.constant 0 : index
    %c0_105 = arith.constant 0 : index
    %239 = vector.load %arg10[%c0_104, %c0_105] : memref<32x64xf32, #tpu.memory_space<vmem>>, vector<32x64xf32>
    %cst_106 = arith.constant dense<0.000000e+00> : vector<8x64xf32>
    %240 = tpu.matmul %238, %239, %cst_106 {dimension_numbers = #tpu.dot_dimension_numbers<[1], [0], [0], [1], [0, 0, 1, 1], [], []>} : vector<8x32xf32>, vector<32x64xf32>, vector<8x64xf32> -> vector<8x64xf32>
    %cst_107 = arith.constant 0.000000e+00 : f32
    %241 = vector.broadcast %cst_107 : f32 to vector<8x64xf32>
    %242 = arith.maximumf %240, %241 : vector<8x64xf32>
    %c0_108 = arith.constant 0 : index
    %c0_109 = arith.constant 0 : index
    %243 = vector.load %arg11[%c0_108, %c0_109] : memref<64x32xf32, #tpu.memory_space<vmem>>, vector<64x32xf32>
    %cst_110 = arith.constant dense<0.000000e+00> : vector<8x32xf32>
    %244 = tpu.matmul %242, %243, %cst_110 {dimension_numbers = #tpu.dot_dimension_numbers<[1], [0], [0], [1], [0, 0, 1, 1], [], []>} : vector<8x64xf32>, vector<64x32xf32>, vector<8x32xf32> -> vector<8x32xf32>
    %245 = arith.addf %244, %238 : vector<8x32xf32>
    %cst_111 = arith.constant dense<0.000000e+00> : vector<8xf32>
    %246 = vector.multi_reduction <add>, %245, %cst_111 [1] : vector<8x32xf32> to vector<8xf32>
    %247 = vector.shape_cast %246 : vector<8xf32> to vector<8x1xf32>
    %cst_112 = arith.constant 3.200000e+01 : f32
    %248 = vector.broadcast %cst_112 : f32 to vector<8x1xf32>
    %249 = arith.divf %247, %248 : vector<8x1xf32>
    %250 = vector.broadcast %249 : vector<8x1xf32> to vector<8x32xf32>
    %251 = arith.subf %245, %250 : vector<8x32xf32>
    %252 = arith.mulf %251, %251 : vector<8x32xf32>
    %cst_113 = arith.constant dense<0.000000e+00> : vector<8xf32>
    %253 = vector.multi_reduction <add>, %252, %cst_113 [1] : vector<8x32xf32> to vector<8xf32>
    %254 = vector.shape_cast %253 : vector<8xf32> to vector<8x1xf32>
    %cst_114 = arith.constant 3.200000e+01 : f32
    %255 = vector.broadcast %cst_114 : f32 to vector<8x1xf32>
    %256 = arith.divf %254, %255 : vector<8x1xf32>
    %257 = vector.broadcast %249 : vector<8x1xf32> to vector<8x32xf32>
    %258 = arith.subf %245, %257 : vector<8x32xf32>
    %cst_115 = arith.constant 9.99999974E-6 : f32
    %259 = vector.broadcast %cst_115 : f32 to vector<8x1xf32>
    %260 = arith.addf %256, %259 : vector<8x1xf32>
    %261 = math.rsqrt %260 : vector<8x1xf32>
    %262 = vector.broadcast %261 : vector<8x1xf32> to vector<8x32xf32>
    %263 = arith.mulf %258, %262 : vector<8x32xf32>
    %c0_116 = arith.constant 0 : index
    %c0_117 = arith.constant 0 : index
    %c0_118 = arith.constant 0 : index
    %264 = vector.load %arg12[%c0_116, %c0_117, %c0_118] : memref<1x8x32xf32, #tpu.memory_space<vmem>>, vector<1x8x32xf32>
    %265 = vector.shape_cast %264 : vector<1x8x32xf32> to vector<8x32xf32>
    %266 = vector.shape_cast %263 : vector<8x32xf32> to vector<1x8x32xf32>
    tpu.vector_store %arg12[%c0_116, %c0_117, %c0_118], %266 {strides = array<i32>} : memref<1x8x32xf32, #tpu.memory_space<vmem>>, vector<1x8x32xf32>,
    return
  }
  func.func @transform_0(%arg0: i32) -> (i32, i32, i32) {
    %c0_i32 = arith.constant 0 : i32
    %c0_i32_0 = arith.constant 0 : i32
    %c0_i32_1 = arith.constant 0 : i32
    return %arg0, %c0_i32, %c0_i32_0 : i32, i32, i32
  }
  func.func @transform_1(%arg0: i32) -> (i32, i32, i32) {
    %c0_i32 = arith.constant 0 : i32
    %c0_i32_0 = arith.constant 0 : i32
    %c0_i32_1 = arith.constant 0 : i32
    return %arg0, %c0_i32, %c0_i32_0 : i32, i32, i32
  }
  func.func @transform_2(%arg0: i32) -> (i32, i32, i32) {
    %c0_i32 = arith.constant 0 : i32
    %c0_i32_0 = arith.constant 0 : i32
    %c0_i32_1 = arith.constant 0 : i32
    return %arg0, %c0_i32, %c0_i32_0 : i32, i32, i32
  }
  func.func @transform_3(%arg0: i32) -> (i32, i32, i32) {
    %c0_i32 = arith.constant 0 : i32
    %c0_i32_0 = arith.constant 0 : i32
    %c0_i32_1 = arith.constant 0 : i32
    return %arg0, %c0_i32, %c0_i32_0 : i32, i32, i32
  }
  func.func @transform_4(%arg0: i32) -> (i32, i32) {
    %c0_i32 = arith.constant 0 : i32
    %c0_i32_0 = arith.constant 0 : i32
    %c0_i32_1 = arith.constant 0 : i32
    return %c0_i32, %c0_i32_0 : i32, i32
  }
  func.func @transform_5(%arg0: i32) -> (i32, i32) {
    %c0_i32 = arith.constant 0 : i32
    %c0_i32_0 = arith.constant 0 : i32
    %c0_i32_1 = arith.constant 0 : i32
    return %c0_i32, %c0_i32_0 : i32, i32
  }
  func.func @transform_6(%arg0: i32) -> (i32, i32) {
    %c0_i32 = arith.constant 0 : i32
    %c0_i32_0 = arith.constant 0 : i32
    %c0_i32_1 = arith.constant 0 : i32
    return %c0_i32, %c0_i32_0 : i32, i32
  }
  func.func @transform_7(%arg0: i32) -> (i32, i32) {
    %c0_i32 = arith.constant 0 : i32
    %c0_i32_0 = arith.constant 0 : i32
    %c0_i32_1 = arith.constant 0 : i32
    return %c0_i32, %c0_i32_0 : i32, i32
  }
  func.func @transform_8(%arg0: i32) -> (i32, i32) {
    %c0_i32 = arith.constant 0 : i32
    %c0_i32_0 = arith.constant 0 : i32
    %c0_i32_1 = arith.constant 0 : i32
    return %c0_i32, %c0_i32_0 : i32, i32
  }
  func.func @transform_9(%arg0: i32) -> (i32, i32) {
    %c0_i32 = arith.constant 0 : i32
    %c0_i32_0 = arith.constant 0 : i32
    %c0_i32_1 = arith.constant 0 : i32
    return %c0_i32, %c0_i32_0 : i32, i32
  }
  func.func @transform_10(%arg0: i32) -> (i32, i32) {
    %c0_i32 = arith.constant 0 : i32
    %c0_i32_0 = arith.constant 0 : i32
    %c0_i32_1 = arith.constant 0 : i32
    return %c0_i32, %c0_i32_0 : i32, i32
  }
  func.func @transform_11(%arg0: i32) -> (i32, i32, i32) {
    %c0_i32 = arith.constant 0 : i32
    %c0_i32_0 = arith.constant 0 : i32
    %c0_i32_1 = arith.constant 0 : i32
    return %arg0, %c0_i32, %c0_i32_0 : i32, i32, i32
  }
  func.func @transform_12(%arg0: i32) -> (i32, i32, i32, i32) {
    %c0_i32 = arith.constant 0 : i32
    %c0_i32_0 = arith.constant 0 : i32
    %c0_i32_1 = arith.constant 0 : i32
    %c0_i32_2 = arith.constant 0 : i32
    return %arg0, %c0_i32, %c0_i32_0, %c0_i32_1 : i32, i32, i32, i32
  }
  func.func @transform_13(%arg0: i32) -> (i32, i32, i32, i32) {
    %c0_i32 = arith.constant 0 : i32
    %c0_i32_0 = arith.constant 0 : i32
    %c0_i32_1 = arith.constant 0 : i32
    %c0_i32_2 = arith.constant 0 : i32
    return %arg0, %c0_i32, %c0_i32_0, %c0_i32_1 : i32, i32, i32, i32
  }
}

</mosaic_0001>

<bundles_post_ra>
// kernel: tpu_custom_call.1
= control target key start
LH: loop header
LB: loop body
LE: loop exit
PB: predicated region body
PF: predicated region fallthrough
CT: control target
= control target key end

     0   :  { %s4711_s0 = inlined_call_operand.hbm [shape: f32[2,8,32], index: 0, kind: input, shape index: {}]   ;;  %s4712_s1 = inlined_call_operand.vmem [shape: f32[2,16,32], index: 1, kind: input, shape index: {}]   ;;  %s4713_s2 = inlined_call_operand.hbm [shape: f32[2,8,8], index: 2, kind: input, shape index: {}]   ;;  %s4714_s3 = inlined_call_operand.hbm [shape: f32[2,8,16], index: 3, kind: input, shape index: {}]   ;;  %s4715_s4 = inlined_call_operand.vmem [shape: f32[32,96], index: 4, kind: input, shape index: {}]   ;;  %s4716_s5 = inlined_call_operand.vmem [shape: f32[32,32], index: 5, kind: input, shape index: {}]   ;;  %s4717_s6 = inlined_call_operand.hbm [shape: f32[32,32], index: 6, kind: input, shape index: {}]   ;;  %s4718_s7 = inlined_call_operand.hbm [shape: f32[32,64], index: 7, kind: input, shape index: {}]   ;;  %s4719_s8 = inlined_call_operand.hbm [shape: f32[32,32], index: 8, kind: input, shape index: {}]   ;;  %s4720_s9 = inlined_call_operand.hbm [shape: f32[32,64], index: 9, kind: input, shape index: {}]   ;;  %s4721_s10 = inlined_call_operand.vmem [shape: f32[64,32], index: 10, kind: input, shape index: {}]   ;;  %s4722_s11 = inlined_call_operand.hbm [shape: f32[2,8,32], index: 11, kind: output, shape index: {0}]   ;;  %s4723_s12 = inlined_call_operand.hbm [shape: f32[2,4,8,8], index: 12, kind: output, shape index: {1}]   ;;  %s4724_s13 = inlined_call_operand.hbm [shape: f32[2,4,8,16], index: 13, kind: output, shape index: {2}]  }
   0x1   :  { %4756 = sst [smem:[#allocation30_spill]] %s4712_s1 }
   0x2   :  { %4757 = sst [smem:[#allocation31_spill]] %s4713_s2 }
   0x3   :  { %4758 = sst [smem:[#allocation32_spill]] %s4716_s5 }
   0x4   :  { %4759 = sst [smem:[#allocation33_spill]] %s4717_s6 }
   0x5   :  { %4760 = sst [smem:[#allocation34_spill]] %s4719_s8 }
   0x6   :  { %4761 = sst [smem:[#allocation35_spill]] %s4721_s10 }
   0x7   :  { %4762 = sst [smem:[#allocation36_spill]] %s4722_s11 }
   0x8   :  { %4763 = sst [smem:[#allocation37_spill]] %s4723_s12 }
   0x9   :  { %4764 = sst [smem:[#allocation38_spill]] %s4724_s13 }
   0xa   :  { %19 = vsyncpa [#allocation3], 0 }
   0xb   :  { %21 = vsyncpa [#allocation3 + $0x1], 0 }
   0xc   :  { %22 = vsyncpa [#allocation6], 0 }
   0xd   :  { %24 = vsyncpa [#allocation6 + $0x1], 0 }
   0xe   :  { %25 = vsyncpa [#allocation9], 0 }
   0xf   :  { %26 = vsyncpa [#allocation12], 0 }
  0x10   :  { %27 = vsyncpa [#allocation4], 0 }
  0x11   :  { %29 = vsyncpa [#allocation4 + $0x1], 0 }
  0x12   :  { %30 = vsyncpa [#allocation16], 0 }
  0x13   :  { %32 = vsyncpa [#allocation16 + $0x1], 0  ;;  %s3972_s25 = smov 0   ;;  %s3974_s26 = smov 0  }
  0x14   :  { %s3976_s27 = smov 0   ;;  %s3978_s28 = smov 0  }
  0x15 LB: > { %4765 = sst [smem:[#allocation24_spill]] %s3858_s25  ;;  %s3872_s29 = smov [#allocation8]   ;;  %s3870_s28 = sphi %s3978_s28, %s4812_s28   ;;  %s3866_s27 = sphi %s3976_s27, %s4816_s27   ;;  %s3862_s26 = sphi %s3974_s26, %s4815_s26   ;;  %s3858_s25 = sphi %s3972_s25, %s4814_s25  }
  0x16   : > { %4766 = sst [smem:[#allocation25_spill]] %s3870_s28  ;;  %s390_s30 = sshll.u32 %s3872_s29, 4  ;;  %s3998_s30 = int_to_ptr.vmem [resolvable:$true] %s390_s30 }
  0x17   : > { %s3993_s14 = sadd.s32 4294967295, %s3870_s28   ;;  %p2911_p0 = scmp.ge.s32.totalorder %s3870_s28, 1 }
  0x18   : > { %p4742_p1 = scmp.eq.s32.totalorder %s3993_s14, 0  ;;  %p372_p2 = scmp.lt.s32.totalorder %s3870_s28, 3 }
  0x19   : > { %s3873_s16 = smov [#allocation11]   ;;  %s4769_s6 = sld [smem:[#allocation33_spill]] }
  0x1a   : > { %p4000_p3 = pnand %p2911_p0, %p372_p2  ;;  %s416_s17 = sshll.u32 %s3873_s16, 4  ;;  %s4013_s17 = int_to_ptr.vmem [resolvable:$true] %s416_s17 }
  0x1c   : > { %s4767_s15 = scalar_select %p4000_p3, 1, 0 }
  0x1d   : > { %p3358_p5 = pneg %p4000_p3 }
  0x1f   : > { %p4009_p6 = pnand %p3358_p5, %p4742_p1  ;;  %s3530_s21 = scalar_lea.hbm %s4769_s6, 512 }
  0x20   : > { %p3531_p7 = scmp.ne.s32.totalorder %s4769_s6, %s3530_s21  ;;  %p3537_p11 = scmp.lt.u32.totalorder %s3530_s21, %s4769_s6 }
  0x21   : > { %s4768_s18 = scalar_select %p4009_p6, 1, 0 }
  0x22   : > { %p4023_p8 = pneg %p4009_p6 }
  0x24   : > { %s4770_s24 = scalar_select %p4023_p8, 1, 0 }
  0x25   : > { %p3533_p9 = pnand %p4023_p8, %p3531_p7 }
  0x27   : > { %p3534_p10 = pneg %p3533_p9 }
  0x29   : > { %p3539_p12 = pnand %p3537_p11, %p3534_p10 }
  0x2b   : > { %3542 = shalt.err (!%p3539_p12)
}
  0x2c   : > { %s3543_s19 = scalar_lea.vmem %s3998_s30, 512  ;;  %p3551_p5 = scmp.lt.s32.totalorder %s3998_s30, %s3998_s30 }
  0x2d   : > { %p3544_p13 = scmp.ne.s32.totalorder %s3998_s30, %s3543_s19  ;;  %p3552_p4 = scmp.lt.s32.totalorder %s3543_s19, %s3543_s19 }
  0x2f   : > { %p3546_p0 = pnand %p3544_p13, %p4023_p8  ;;  %p3553_p7 = por %p3552_p4, %p3551_p5 }
  0x31   : > { %p3547_p2 = pneg %p3546_p0 }
  0x33   : > { %p3554_p9 = pnand %p3553_p7, %p3547_p2 }
  0x35   : > { %3557 = shalt.err (!%p3554_p9)
}
  0x36   : > { %s4731_s20 = smov 128   ;;  %s4733_s21 = smov 8  }
  0x37   : > { %3361 = dma.hbm_to_vmem [thread:$0]  (!%p4009_p6), %s4769_s6, 512, %s3998_s30, [#allocation9], %s4731_s20, %s4731_s20, %s4733_s21  }
  0x38   : > { %s4771_s8 = sld [smem:[#allocation34_spill]] }
  0x3e   : > { %s3558_s19 = scalar_lea.hbm %s4771_s8, 512 }
  0x3f   : > { %p3559_p4 = scmp.ne.s32.totalorder %s4771_s8, %s3558_s19  ;;  %p3565_p12 = scmp.lt.u32.totalorder %s3558_s19, %s4771_s8 }
  0x41   : > { %p3561_p10 = pnand %p3559_p4, %p4023_p8 }
  0x43   : > { %p3562_p11 = pneg %p3561_p10 }
  0x45   : > { %p3567_p13 = pnand %p3565_p12, %p3562_p11 }
  0x47   : > { %3570 = shalt.err (!%p3567_p13)
}
  0x48   : > { %s3571_s30 = scalar_lea.vmem %s4013_s17, 512  ;;  %p3579_p7 = scmp.lt.s32.totalorder %s4013_s17, %s4013_s17 }
  0x49   : > { %p3572_p0 = scmp.ne.s32.totalorder %s4013_s17, %s3571_s30  ;;  %p3580_p9 = scmp.lt.s32.totalorder %s3571_s30, %s3571_s30 }
  0x4b   : > { %p3574_p2 = pnand %p3572_p0, %p4023_p8  ;;  %p3581_p4 = por %p3580_p9, %p3579_p7 }
  0x4d   : > { %p3575_p5 = pneg %p3574_p2 }
  0x4f   : > { %p3582_p10 = pnand %p3581_p4, %p3575_p5 }
  0x51   : > { %3585 = shalt.err (!%p3582_p10)
}
  0x52   : > { %3367 = dma.hbm_to_vmem [thread:$0]  (!%p4009_p6), %s4771_s8, 512, %s4013_s17, [#allocation12], %s4731_s20, %s4731_s20, %s4733_s21  }
  0x53   : > { %s4730_s12 = sadd.s32 4294967294, %s3870_s28   ;;  %s4075_s13 = sadd.s32 1, %s3870_s28  }
  0x54   : > { %4772 = sst [smem:[#allocation26_spill]] %s4075_s13  ;;  %s42_s22 = ssub.s32 %s3870_s28, %s4075_s13 }
  0x55   : > { %s45_s23 = sadd.s32 1, %s3866_s27  ;;  %p43_p11 = scmp.eq.s32.totalorder %s42_s22, 0 }
  0x56   : > { %p52_p12 = scmp.ne.s32.totalorder %s3866_s27, %s3862_s26  ;;  %p53_p13 = scmp.eq.s32.totalorder %s3870_s28, 0 }
  0x57   : > { %p58_p0 = scmp.ne.s32.totalorder %s3862_s26, %s3858_s25  ;;  %p307_p7 = scmp.eq.s32.totalorder %s3993_s14, 1 }
  0x58   : > { %s4086_s29 = scalar_select %p43_p11, %s3866_s27, %s45_s23  }
  0x59   : > { %p54_p2 = por %p53_p13, %p52_p12  ;;  %p4090_p5 = por %p4742_p1, %p58_p0 }
  0x5a   : > { %4773 = sst [smem:[#allocation27_spill]] %s4086_s29  ;;  %p313_p9 = scmp.eq.s32.totalorder %s4730_s12, 1 }
  0x5b   : > { %s4774_s16 = scalar_select %p4090_p5, 1, 0 }
  0x5c   : > { %p3395_p4 = scmp.lt.s32.totalorder %s3870_s28, 2  ;;  %s4735_s17 = sand.u32 1, %s3866_s27  }
  0x5d   : > { %p4099_p10 = por %p307_p7, %p52_p12  ;;  %p4103_p3 = por %p313_p9, %p58_p0 }
  0x5e   : > { %s4109_s10 = sshll.u32 %s4735_s17, 3  ;;  %s4112_s11 = sshll.u32 %s3870_s28, 7 }
  0x5f   : > { %s4775_s19 = scalar_select %p4099_p10, 1, 0 }
  0x60   : > { %s4777_s30 = scalar_select %p4103_p3, 1, 0 }
  0x61   : > { %4776 = sst [smem:[#allocation28_spill]] %s4775_s19  ;;  %p4114_p11 = pnand %p3395_p4, %p54_p2 }
  0x62   : > { %4778 = sst [smem:[#allocation29_spill]] %s4777_s30  ;;  %s472_s23 = sand.u32 1, %s3870_s28  }
  0x63   : > { %s4779_s22 = scalar_select %p4114_p11, 1, 0 }
  0x64   : > { %s4780_s2 = sld [smem:[#allocation31_spill]]  ;;  %s476_s17 = scalar_lea.vmem [#allocation5], %s4109_s10 }
  0x65   : > { %s483_s6 = sshll.u32 %s476_s17, 4  ;;  %s3876_s8 = smov [#allocation10]   ;;  %s4126_s6 = int_to_ptr.vmem [resolvable:$true] %s483_s6 }
  0x66   : > { %s4128_s29 = sshll.u32 %s3876_s8, 4  ;;  %s4130_s13 = scalar_lea.sflag [#allocation6], %s472_s23  ;;  %s404_s29 = int_to_ptr.vmem [resolvable:$true] %s4128_s29 }
  0x67   : > { %p4136_p13 = pneg %p4114_p11 }
  0x69   : > { %s4781_s20 = scalar_select %p4136_p13, 1, 0 }
  0x6a   : > { %s4123_s21 = scalar_lea.hbm %s4780_s2, %s4112_s11  ;;  %s3591_s28 = scalar_lea.hbm %s4780_s2, 256 }
  0x6b   : > { %s3586_s30 = scalar_lea.hbm %s4123_s21, 128  ;;  %p3592_p7 = scmp.lt.u32.totalorder %s4123_s21, %s4780_s2 }
  0x6c   : > { %p3587_p12 = scmp.ne.s32.totalorder %s4123_s21, %s3586_s30  ;;  %p3593_p9 = scmp.lt.u32.totalorder %s3591_s28, %s3586_s30 }
  0x6d   : > { %p3595_p1 = scmp.lt.u32.totalorder %s3586_s30, %s4123_s21 }
  0x6e   : > { %p3589_p0 = pnand %p4136_p13, %p3587_p12  ;;  %p3594_p4 = por %p3593_p9, %p3592_p7 }
  0x70   : > { %p3590_p2 = pneg %p3589_p0  ;;  %p3596_p3 = por %p3595_p1, %p3594_p4 }
  0x72   : > { %p3597_p10 = pnand %p3596_p3, %p3590_p2 }
  0x74   : > { %3600 = shalt.err (!%p3597_p10)
}
  0x75   : > { %s3601_s23 = scalar_lea.vmem %s4126_s6, 128  ;;  %s3877_s12 = smov [#allocation5]  }
  0x76   : > { %p3602_p12 = scmp.ne.s32.totalorder %s4126_s6, %s3601_s23  ;;  %s3606_s17 = sshll.u32 %s3877_s12, 4  ;;  %s3607_s17 = int_to_ptr.vmem [resolvable:$false] %s3606_s17 }
  0x77   : > { %s3608_s25 = scalar_lea.vmem %s3607_s17, 256  ;;  %p3609_p6 = scmp.lt.s32.totalorder %s4126_s6, %s3607_s17 }
  0x78   : > { %p3604_p0 = pnand %p3602_p12, %p4136_p13  ;;  %p3610_p8 = scmp.lt.s32.totalorder %s3608_s25, %s3601_s23 }
  0x7a   : > { %p3605_p5 = pneg %p3604_p0  ;;  %p3611_p7 = por %p3610_p8, %p3609_p6 }
  0x7c   : > { %p3612_p9 = pnand %p3611_p7, %p3605_p5 }
  0x7e   : > { %3615 = shalt.err (!%p3612_p9)
}
  0x7f   : > { %3377 = dma.hbm_to_vmem [thread:$0]  (!%p4114_p11), %s4123_s21, 128, %s4126_s6, %s4130_s13  }
  0x80   : > { %s3616_s8 = scalar_lea.hbm %s4718_s7, 512  ;;  %p4782_p3 = scmp.ne.s32.totalorder %s4770_s24, 0 }
  0x81   : > { %p3617_p1 = scmp.ne.s32.totalorder %s4718_s7, %s3616_s8  ;;  %p3623_p5 = scmp.lt.u32.totalorder %s3616_s8, %s4718_s7 }
  0x83   : > { %p3619_p6 = pnand %p3617_p1, %p4782_p3 }
  0x85   : > { %p3620_p8 = pneg %p3619_p6 }
  0x87   : > { %p3625_p10 = pnand %p3623_p5, %p3620_p8 }
  0x89   : > { %3628 = shalt.err (!%p3625_p10)
}
  0x8a   : > { %s3629_s25 = scalar_lea.vmem %s404_s29, 512  ;;  %p3637_p0 = scmp.lt.s32.totalorder %s404_s29, %s404_s29 }
  0x8b   : > { %p3630_p2 = scmp.ne.s32.totalorder %s404_s29, %s3629_s25  ;;  %p3638_p7 = scmp.lt.s32.totalorder %s3629_s25, %s3629_s25 }
  0x8d   : > { %p3632_p4 = pnand %p3630_p2, %p4782_p3  ;;  %p3639_p9 = por %p3638_p7, %p3637_p0 }
  0x8f   : > { %p3633_p12 = pneg %p3632_p4 }
  0x91   : > { %p3640_p11 = pnand %p3639_p9, %p3633_p12 }
  0x93   : > { %3643 = shalt.err (!%p3640_p11)
}
  0x94   : > { %p4783_p1 = scmp.ne.s32.totalorder %s4768_s18, 0  ;;  %s4784_s2 = smov 8  }
  0x95   : > { %s4785_s6 = smov 128   ;;  %s3878_s30 = smov [#allocation13]  }
  0x96   : > { %3364 = dma.hbm_to_vmem [thread:$0]  (!%p4783_p1), %s4718_s7, 512, %s404_s29, [#allocation9], %s4785_s6, %s4785_s6, %s4784_s2  }
  0x97   : > { %s429_s8 = sshll.u32 %s3878_s30, 4  ;;  %s3644_s17 = scalar_lea.hbm %s4720_s9, 512  ;;  %s430_s8 = int_to_ptr.vmem [resolvable:$true] %s429_s8 }
  0x98   : > { %p3645_p11 = scmp.ne.s32.totalorder %s4720_s9, %s3644_s17  ;;  %p3651_p5 = scmp.lt.u32.totalorder %s3644_s17, %s4720_s9 }
  0x9a   : > { %p3647_p6 = pnand %p3645_p11, %p4782_p3 }
  0x9c   : > { %p3648_p8 = pneg %p3647_p6 }
  0x9e   : > { %p3653_p10 = pnand %p3651_p5, %p3648_p8 }
  0xa0   : > { %3656 = shalt.err (!%p3653_p10)
}
  0xa1   : > { %s3657_s29 = scalar_lea.vmem %s430_s8, 512  ;;  %p3665_p0 = scmp.lt.s32.totalorder %s430_s8, %s430_s8 }
  0xa2   : > { %p3658_p2 = scmp.ne.s32.totalorder %s430_s8, %s3657_s29  ;;  %p3666_p7 = scmp.lt.s32.totalorder %s3657_s29, %s3657_s29 }
  0xa4   : > { %p3660_p4 = pnand %p3658_p2, %p4782_p3  ;;  %p3667_p9 = por %p3666_p7, %p3665_p0 }
  0xa6   : > { %p3661_p12 = pneg %p3660_p4 }
  0xa8   : > { %p3668_p13 = pnand %p3667_p9, %p3661_p12 }
  0xaa   : > { %3671 = shalt.err (!%p3668_p13)
}
  0xab   : > { %3370 = dma.hbm_to_vmem [thread:$0]  (!%p4783_p1), %s4720_s9, 512, %s430_s8, [#allocation12], %s4785_s6, %s4785_s6, %s4784_s2  }
  0xac   : > { %s4207_s21 = scalar_lea.hbm %s4711_s0, %s4112_s11  ;;  %s450_s18 = scalar_lea.vmem [#allocation2], %s4109_s10 }
  0xad   : > { %s457_s28 = sshll.u32 %s450_s18, 4  ;;  %s4786_s30 = sand.u32 1, %s3866_s27   ;;  %s458_s28 = int_to_ptr.vmem [resolvable:$true] %s457_s28 }
  0xae   : > { %s447_s12 = scalar_lea.sflag [#allocation3], %s4786_s30  ;;  %s3672_s23 = scalar_lea.hbm %s4207_s21, 128 }
  0xaf   : > { %p3673_p13 = scmp.ne.s32.totalorder %s4207_s21, %s3672_s23  ;;  %p4787_p3 = scmp.ne.s32.totalorder %s4781_s20, 0 }
  0xb0   : > { %s3677_s8 = scalar_lea.hbm %s4711_s0, 256  ;;  %p3678_p1 = scmp.lt.u32.totalorder %s4207_s21, %s4711_s0 }
  0xb1   : > { %p3675_p11 = pnand %p3673_p13, %p4787_p3  ;;  %p3679_p8 = scmp.lt.u32.totalorder %s3677_s8, %s3672_s23 }
  0xb2   : > { %p3681_p10 = scmp.lt.u32.totalorder %s3672_s23, %s4207_s21 }
  0xb3   : > { %p3676_p6 = pneg %p3675_p11  ;;  %p3680_p5 = por %p3679_p8, %p3678_p1 }
  0xb5   : > { %p3682_p2 = por %p3681_p10, %p3680_p5 }
  0xb7   : > { %p3683_p4 = pnand %p3682_p2, %p3676_p6 }
  0xb9   : > { %3686 = shalt.err (!%p3683_p4)
}
  0xba   : > { %s3687_s29 = scalar_lea.vmem %s458_s28, 128  ;;  %s3879_s1 = smov [#allocation2]  }
  0xbb   : > { %p3688_p12 = scmp.ne.s32.totalorder %s458_s28, %s3687_s29  ;;  %s3692_s5 = sshll.u32 %s3879_s1, 4  ;;  %s3693_s5 = int_to_ptr.vmem [resolvable:$false] %s3692_s5 }
  0xbc   : > { %s3694_s24 = scalar_lea.vmem %s3693_s5, 256  ;;  %p3695_p9 = scmp.lt.s32.totalorder %s458_s28, %s3693_s5 }
  0xbd   : > { %p3690_p0 = pnand %p3688_p12, %p4787_p3  ;;  %p3696_p13 = scmp.lt.s32.totalorder %s3694_s24, %s3687_s29 }
  0xbf   : > { %p3691_p7 = pneg %p3690_p0  ;;  %p3697_p11 = por %p3696_p13, %p3695_p9 }
  0xc1   : > { %p3698_p1 = pnand %p3697_p11, %p3691_p7 }
  0xc3   : > { %3701 = shalt.err (!%p3698_p1)
}
  0xc4   : > { %p4788_p8 = scmp.ne.s32.totalorder %s4779_s22, 0  ;;  %s4233_s30 = scalar_lea.hbm %s4714_s3, %s4112_s11 }
  0xc5   : > { %s494_s23 = scalar_lea.vmem [#allocation7], %s4109_s10  ;;  %s3702_s6 = scalar_lea.hbm %s4233_s30, 128 }
  0xc6   : > { %3374 = dma.hbm_to_vmem [thread:$0]  (!%p4788_p8), %s4207_s21, 128, %s458_s28, %s447_s12  }
  0xc7   : > { %s501_s2 = sshll.u32 %s494_s23, 4  ;;  %p3703_p6 = scmp.ne.s32.totalorder %s4233_s30, %s3702_s6  ;;  %s502_s2 = int_to_ptr.vmem [resolvable:$true] %s501_s2 }
  0xc8   : > { %s3707_s21 = scalar_lea.hbm %s4714_s3, 256  ;;  %p3708_p2 = scmp.lt.u32.totalorder %s4233_s30, %s4714_s3 }
  0xc9   : > { %p3705_p5 = pnand %p3703_p6, %p4787_p3  ;;  %p3709_p4 = scmp.lt.u32.totalorder %s3707_s21, %s3702_s6 }
  0xca   : > { %p3711_p0 = scmp.lt.u32.totalorder %s3702_s6, %s4233_s30 }
  0xcb   : > { %p3706_p10 = pneg %p3705_p5  ;;  %p3710_p12 = por %p3709_p4, %p3708_p2 }
  0xcd   : > { %p3712_p7 = por %p3711_p0, %p3710_p12 }
  0xcf   : > { %p3713_p9 = pnand %p3712_p7, %p3706_p10 }
  0xd1   : > { %3716 = shalt.err (!%p3713_p9)
}
  0xd2   : > { %s3717_s10 = scalar_lea.vmem %s502_s2, 128  ;;  %s3880_s11 = smov [#allocation7]  }
  0xd3   : > { %p3718_p13 = scmp.ne.s32.totalorder %s502_s2, %s3717_s10  ;;  %s3722_s25 = sshll.u32 %s3880_s11, 4  ;;  %s3723_s25 = int_to_ptr.vmem [resolvable:$false] %s3722_s25 }
  0xd4   : > { %s3724_s29 = scalar_lea.vmem %s3723_s25, 256  ;;  %p3725_p6 = scmp.lt.s32.totalorder %s502_s2, %s3723_s25 }
  0xd5   : > { %p3720_p11 = pnand %p3718_p13, %p4787_p3  ;;  %p3726_p5 = scmp.lt.s32.totalorder %s3724_s29, %s3717_s10 }
  0xd7   : > { %p3721_p1 = pneg %p3720_p11  ;;  %p3727_p8 = por %p3726_p5, %p3725_p6 }
  0xd9   : > { %p3728_p2 = pnand %p3727_p8, %p3721_p1 }
  0xdb   : > { %3731 = shalt.err (!%p3728_p2)
}
  0xdc   : > { %p4789_p4 = scmp.ne.s32.totalorder %s4779_s22, 0  ;;  %p4790_p10 = scmp.ne.s32.totalorder %s4767_s15, 0 }
  0xdd   : > { %s4257_s20 = sand.u32 (!%p4790_p10), 1, %s3862_s26   ;;  %p4791_p3 = scmp.ne.s32.totalorder (!%p4790_p10), %s4774_s16, 0 }
  0xde   : > { %3380 = dma.hbm_to_vmem [thread:$0]  (!%p4789_p4), %s4233_s30, 128, %s502_s2, %s4130_s13  }
  0xdf   : > { %510 = sbr.rel (%p4790_p10) target bundleno = 5556 (0x15b4), region = 64  ;;  %s4260_s1 = sshll.u32 (!%p4790_p10), %s4257_s20, 3 }
  0xe0   : > { %s513_s5 = scalar_lea.sflag (!%p4790_p10), [#allocation3], %s4257_s20  ;;  %s516_s24 = scalar_lea.vmem (!%p4790_p10), [#allocation2], %s4260_s1 }
  0xe6   : > { %3833 = dma.done.wait (%p4791_p3), %s513_s5, 128  }
  0xe7   : > { %3835 = vsyncadd (%p4791_p3), %s513_s5, 4294967168  ;;  %s521_s15 = sand.u32 1, %s3993_s14   ;;  %s525_s22 = scalar_lea.vmem [#allocation5], %s4260_s1 }
  0xe8   : > { %s522_s13 = scalar_lea.sflag [#allocation6], %s521_s15 }
  0xe9   : > { %3837 = dma.done.wait (%p4791_p3), %s522_s13, 256  }
  0xea   : > { %3839 = vsyncadd (%p4791_p3), %s522_s13, 4294967040  ;;  %s534_s19 = scalar_lea.vmem [#allocation7], %s4260_s1  ;;  %p4792_p8 = scmp.eq.s32.totalorder %s3993_s14, 0 }
  0xec   : > { %3841 = dma.done.wait (%p4792_p8), [#allocation9], 1024   ;;  %p4793_p12 = pmov %p4792_p8 }
  0xed   : > { %p4794_p0 = pmov %p4792_p8 }
  0xee   : > { %3843 = vsyncadd (%p4793_p12), [#allocation9], 4294966272 }
  0xef   : > { %3845 = dma.done.wait (%p4794_p0), [#allocation12], 1024   ;;  %p4795_p7 = pmov %p4794_p0 }
  0xf0   : > { %v3881_v0 = vmov 0.0|0.0   ;;  %vm3882_vm0 = vmmov 0   ;;  %v3883_v1 = vmov 0.0   ;;  %v626_v2 = vld [vmem:[%s4715_s4] sm:$0xff]  ;;  %v627_v3 = vld [vmem:[%s4715_s4 + $0x8] sm:$0xff]  ;;  %v628_v4 = vld [vmem:[%s4715_s4 + $0x10] sm:$0xff] }
  0xf1   : > { %3847 = vsyncadd (%p4795_p7), [#allocation12], 4294966272  ;;  %3252 = vmatprep.subr.bf16.mxu1 %v3881_v0  ;;  %3079 = vmatprep.mubr.msk.f32.mxu1 %vm3882_vm0, %v3883_v1  ;;  %v3253_v5 = vpack.c.bf16 %v627_v3, %v626_v2  ;;  %v629_v6 = vld [vmem:[%s4715_s4 + $0x18] sm:$0xff]  ;;  %v4304_v8 = vld [vmem:[%s516_s24] sm:$0xff]  ;;  %vm630_vm1 = vcmask 261120   ;;  %s3884_s21 = smov 120  }
  0xf2   : > { %3092 = vmatprep.subr.mxu0 %v3883_v1  ;;  %3094 = vmatprep.mubr.msk.f32.mxu0 %vm3882_vm0, %v3883_v1  ;;  %v3256_v7 = vpack.c.bf16 %v629_v6, %v628_v4  ;;  %s3885_s28 = smov 96   ;;  %s3886_s12 = smov 80   ;;  %vm708_vm2 = vcmask 64512   ;;  %v704_v19 = vld [vmem:[%s525_s22] sm:$0xff]  ;;  %vm1393_vm3 = vcmask 130048   ;;  %vm1395_vm4 = vcmask 195584  }
  0xf3   : > { %3254 = vmatpush3.bf16.msra.mxu1 %v3253_v5  ;;  %s3887_s10 = smov 88   ;;  %s3888_s11 = smov 72   ;;  %vm4434_vm5 = vmpackc.low %vm708_vm2, %vm708_vm2  ;;  %vm2542_vm6 = vcmask 523264  }
  0xf4   : > { %3255 = vmatprep.subr.bf16.mxu1 %v3881_v0  ;;  %s3889_s25 = smov 112   ;;  %s3890_s29 = smov 104  }
  0xf5   : > { %s3891_s5 = smov 56   ;;  %s3892_s24 = smov 64  }
  0xf6   : > { %s3893_s13 = smov 48   ;;  %s3894_s22 = smov 40  }
  0xf7   : > { %3257 = vmatpush3.bf16.msra.mxu1 %v3256_v7  ;;  %s2932_s16 = sshll.u32 %s4257_s20, 5  ;;  %s4796_s2 = sld [smem:[#allocation32_spill]] }
  0xf8   : > { %3082 = vmatprep.subr.mxu1 %v3883_v1  ;;  %s4366_s18 = scalar_lea.vmem [#allocation15], %s2932_s16  ;;  %s3895_s17 = smov 8  }
  0xf9   : > { %s3896_s30 = smov 16   ;;  %s3897_s23 = smov 24  }
  0xfa   : > { %3080 = vmatmul.mubr.msk.f32.vlgmr.msra.gmra.mrb[0].mxu1 %vm630_vm1, %v4304_v8  ;;  %p618_p9 = scmp.lt.s32.totalorder %s3993_s14, 1 }
  0xfb   : > { %3084 = vmatprep.mubr.msk.f32.mxu1 %vm3882_vm0, %v3883_v1 }
  0xfc   : > { %s619_s6 = scalar_select %p618_p9, %s3993_s14, 1 }
  0xfe   : > { %s2988_s8 = sshll.u32 %s619_s6, 4 }
 0x1cd   : > { %v4311_v9 = vpop.f32.mrb[0].mxu1 }
 0x1ce   : > { %873 = vrot.lane.b32.xlu1 %v4311_v9, %s3884_s21  ;;  %706 = vrot.lane.b32.xlu0 %v4311_v9, %s3885_s28  ;;  %v3081_v10 = vpop.f32.mrb[1].mxu1 }
 0x1d2   : > { %1044 = vrot.lane.b32.xlu1 %v4311_v9, %s3886_s12  ;;  %875 = vrot.lane.b32.xlu0 %v4311_v9, %s3887_s10 }
 0x1d6   : > { %1213 = vrot.lane.b32.xlu1 %v4311_v9, %s3888_s11  ;;  %1042 = vrot.lane.b32.xlu0 %v4311_v9, %s3889_s25 }
 0x1da   : > { %1211 = vrot.lane.b32.xlu0 %v4311_v9, %s3890_s29 }
 0x240   : > { %v874_v11 = vpop.permute.xlu1 %873  ;;  %v707_v12 = vpop.permute.xlu0 %706 }
 0x241   : > { %3083 = vmatpush3.xpose.msk.msra.mxu1 %vm708_vm2, %v707_v12 }
 0x242   : > { %3087 = vmatprep.subr.mxu1 %v3883_v1 }
 0x244   : > { %3085 = vmatmul.mubr.msk.f32.vlgmr.msra.gmra.mrb[2].mxu1 %vm708_vm2, %v4311_v9  ;;  %v876_v13 = vpop.permute.xlu0 %875  ;;  %v1045_v14 = vpop.permute.xlu1 %1044 }
 0x245   : > { %3093 = vmatpush3.xpose.msk.msra.mxu0 %vm708_vm2, %v876_v13  ;;  %3089 = vmatprep.mubr.msk.f32.mxu1 %vm3882_vm0, %v3883_v1 }
 0x246   : > { %3102 = vmatprep.subr.mxu0 %v3883_v1 }
 0x248   : > { %3095 = vmatmul.mubr.msk.f32.vlgmr.msra.gmra.mrb[0].mxu0 %vm708_vm2, %v874_v11  ;;  %v1043_v15 = vpop.permute.xlu0 %1042  ;;  %v1214_v16 = vpop.permute.xlu1 %1213 }
 0x249   : > { %3103 = vmatpush3.xpose.msk.msra.mxu0 %vm708_vm2, %v1045_v14  ;;  %3104 = vmatprep.mubr.msk.f32.mxu0 %vm3882_vm0, %v3883_v1  ;;  %v1397_v14 = vld [vmem:[%s4796_s2] sm:$0xff] }
 0x24a   : > { %3112 = vmatprep.subr.mxu0 %v3883_v1 }
 0x24c   : > { %3105 = vmatmul.mubr.msk.f32.vlgmr.msra.gmra.mrb[2].mxu0 %vm708_vm2, %v1043_v15  ;;  %v1212_v17 = vpop.permute.xlu0 %1211  ;;  %v1398_v15 = vld [vmem:[%s4796_s2 + $0x8] sm:$0xff] }
 0x24d   : > { %3113 = vmatpush3.xpose.msk.msra.mxu0 %vm708_vm2, %v1214_v16  ;;  %3114 = vmatprep.mubr.msk.f32.mxu0 %vm3882_vm0, %v3883_v1  ;;  %v3259_v16 = vpack.c.bf16 %v1398_v15, %v1397_v14 }
 0x24e   : > { %3258 = vmatprep.subr.bf16.mxu0 %v3881_v0 }
 0x250   : > { %3115 = vmatmul.mubr.msk.f32.vlgmr.msra.gmra.mrb[4].mxu0 %vm708_vm2, %v1212_v17 }
 0x251   : > { %3130 = vmatprep.mubr.msk.f32.mxu0 %vm3882_vm0, %v3883_v1  ;;  %3260 = vmatpush3.bf16.msra.mxu0 %v3259_v16 }
 0x252   : > { %3261 = vmatprep.subr.bf16.mxu0 %v3881_v0 }
 0x317   : > { %v779_v18 = vpop.f32.mrb[2].mxu1 }
 0x318   : > { %v783_v20 = vmul.f32 0.35355338, %v779_v18  ;;  %v3086_v21 = vpop.f32.mrb[3].mxu1 }
 0x319   : > { %v1399_v21 = vld [vmem:[%s4796_s2 + $0x10] sm:$0xff] }
 0x31a   : > { %v784_v22 = vadd.f32 %v783_v20, %v704_v19 }
 0x31b   : > { %v947_v23 = vpop.f32.mrb[0].mxu0 }
 0x31c   : > { %v951_v24 = vmul.f32 0.35355338, %v947_v23  ;;  %v3096_v25 = vpop.f32.mrb[1].mxu0  ;;  %v785_v26 = vsel %vm708_vm2, %v784_v22, -inf }
 0x31d   : > { %786 = vmax.xlane.f32.xlu1 %v785_v26 }
 0x31e   : > { %v952_v27 = vadd.f32 %v951_v24, %v704_v19 }
 0x31f   : > { %v1116_v28 = vpop.f32.mrb[2].mxu0 }
 0x320   : > { %v1120_v29 = vmul.f32 0.35355338, %v1116_v28  ;;  %v3106_v30 = vpop.f32.mrb[3].mxu0  ;;  %v953_v31 = vsel %vm708_vm2, %v952_v27, -inf }
 0x321   : > { %954 = vmax.xlane.f32.xlu0 %v953_v31 }
 0x322   : > { %v1121_v32 = vadd.f32 %v1120_v29, %v704_v19 }
 0x323   : > { %v1285_v33 = vpop.f32.mrb[4].mxu0 }
 0x324   : > { %v1289_v34 = vmul.f32 0.35355338, %v1285_v33  ;;  %v3116_v35 = vpop.f32.mrb[5].mxu0  ;;  %v1122_v36 = vsel %vm708_vm2, %v1121_v32, -inf }
 0x325   : > { %1123 = vmax.xlane.f32.xlu0 %v1122_v36 }
 0x326   : > { %v1290_v37 = vadd.f32 %v1289_v34, %v704_v19 }
 0x328   : > { %v1291_v38 = vsel %vm708_vm2, %v1290_v37, -inf }
 0x329   : > { %1292 = vmax.xlane.f32.xlu1 %v1291_v38  ;;  %v1565_v38 = vld [vmem:[#allocation10] sm:$0xff] }
 0x33a   : > { %966 = vrot.lane.b32.xlu1 %v4311_v9, %s3891_s5 }
 0x3aa   : > { %v787_v39 = vpop.xlane.xlu1 %786 }
 0x3ab   : > { %v788_v40 = vsub.f32 %v784_v22, %v787_v39  ;;  %v1400_v22 = vld [vmem:[%s4796_s2 + $0x18] sm:$0xff] }
 0x3ac   : > { %v3262_v23 = vpack.c.bf16 %v1400_v22, %v1399_v21  ;;  %v1566_v39 = vld [vmem:[#allocation10 + $0x8] sm:$0xff] }
 0x3ad   : > { %v789_v41 = vmul.f32 1.442695, %v788_v40  ;;  %v1567_v40 = vld [vmem:[#allocation10 + $0x10] sm:$0xff] }
 0x3ae   : > { %v955_v42 = vpop.xlane.xlu0 %954  ;;  %3263 = vmatpush3.bf16.msra.mxu0 %v3262_v23 }
 0x3af   : > { %3492 = vpow2.f32 %v789_v41  ;;  %v956_v43 = vsub.f32 %v952_v27, %v955_v42  ;;  %v3270_v41 = vpack.c.bf16 %v1566_v39, %v1565_v38  ;;  %v1568_v42 = vld [vmem:[#allocation10 + $0x18] sm:$0xff] }
 0x3b1   : > { %v957_v44 = vmul.f32 1.442695, %v956_v43  ;;  %v3274_v43 = vpack.c.bf16 %v1568_v42, %v1567_v40  ;;  %3271 = vmatprep.subr.bf16.mxu0 %v3270_v41 }
 0x3b2   : > { %v1124_v54 = vpop.xlane.xlu0 %1123 }
 0x3b3   : > { %3494 = vpow2.f32 %v957_v44  ;;  %v1125_v55 = vsub.f32 %v1121_v32, %v1124_v54  ;;  %v1491_v54 = vld [vmem:[#allocation8 + $0x18] sm:$0xff] }
 0x3b5   : > { %v1126_v56 = vmul.f32 1.442695, %v1125_v55 }
 0x3b6   : > { %v1293_v45 = vpop.xlane.xlu1 %1292 }
 0x3b7   : > { %v1294_v46 = vsub.f32 %v1290_v37, %v1293_v45 }
 0x3b9   : > { %v3493_v47 = vpop.eup %3492  ;;  %v1295_v48 = vmul.f32 1.442695, %v1294_v46 }
 0x3ba   : > { %v791_v49 = vsel %vm708_vm2, %v3493_v47, 0.0  ;;  %v967_v59 = vpop.permute.xlu1 %966 }
 0x3bb   : > { %3496 = vpow2.f32 %v1295_v48  ;;  %792 = vadd.xlane.f32.xlu0 %v791_v49 }
 0x3bc   : > { %3498 = vpow2.f32 %v1126_v56 }
 0x3bd   : > { %v3495_v50 = vpop.eup %3494 }
 0x3be   : > { %v959_v51 = vsel %vm708_vm2, %v3495_v50, 0.0 }
 0x3bf   : > { %960 = vadd.xlane.f32.xlu1 %v959_v51  ;;  %v1489_v51 = vld [vmem:[#allocation8 + $0x8] sm:$0xff] }
 0x3c5   : > { %v3497_v52 = vpop.eup %3496 }
 0x3c6   : > { %v1297_v53 = vsel %vm708_vm2, %v3497_v52, 0.0  ;;  %v3499_v57 = vpop.eup %3498 }
 0x3c7   : > { %1298 = vadd.xlane.f32.xlu1 %v1297_v53  ;;  %v1128_v58 = vsel %vm708_vm2, %v3499_v57, 0.0 }
 0x3d1   : > { %797 = vrot.lane.b32.xlu0 %v4311_v9, %s3892_s24 }
 0x3d8   : > { %1135 = vrot.lane.b32.xlu1 %v4311_v9, %s3893_s13  ;;  %s4797_s13 = sld [smem:[#allocation30_spill]] }
 0x3f0   : > { %1129 = vadd.xlane.f32.xlu0 %v1128_v58 }
 0x406   : > { %1304 = vrot.lane.b32.xlu0 %v4311_v9, %s3894_s22  ;;  %s622_s22 = scalar_lea.vmem %s4797_s13, %s2988_s8  ;;  %s3898_s8 = smov [#allocation15]  }
 0x407   : > { %v624_v48 = vld [vmem:[%s622_s22] sm:$0xff]  ;;  %v625_v49 = vld [vmem:[%s622_s22 + $0x8] sm:$0xff]  ;;  %s3736_s5 = sshll.u32 %s3898_s8, 4  ;;  %s3737_s5 = int_to_ptr.vmem [resolvable:$false] %s3736_s5 }
 0x408   : > { %s3738_s24 = scalar_lea.vmem %s3737_s5, 1024 }
 0x448   : > { %v793_v60 = vpop.xlane.xlu0 %792 }
 0x449   : > { %3500 = vrcp.f32 %v793_v60 }
 0x44c   : > { %v798_v61 = vpop.permute.xlu0 %797  ;;  %v961_v62 = vpop.xlane.xlu1 %960 }
 0x44d   : > { %3502 = vrcp.f32 %v961_v62  ;;  %3088 = vmatpush3.msra.mxu1 %v798_v61 }
 0x44e   : > { %3097 = vmatprep.subr.mxu1 %v3883_v1 }
 0x453   : > { %v3501_v63 = vpop.eup %3500 }
 0x454   : > { %v795_v2 = vmul.f32 %v3501_v63, %v3493_v47  ;;  %v1299_v3 = vpop.xlane.xlu1 %1298 }
 0x455   : > { %3504 = vrcp.f32 %v1299_v3 }
 0x456   : > { %796 = vst.msk [vmem:[%s4366_s18] sm:$0xff] %vm708_vm2, %v795_v2  ;;  %3090 = vmatmul.mubr.msk.f32.vlgmr.msra.gmra.mrb[4].mxu1 %vm708_vm2, %v795_v2 }
 0x457   : > { %v3503_v4 = vpop.eup %3502  ;;  %3098 = vmatpush3.msra.mxu1 %v967_v59  ;;  %3099 = vmatprep.mubr.msk.f32.mxu1 %vm3882_vm0, %v3883_v1 }
 0x458   : > { %v963_v5 = vmul.f32 %v3503_v4, %v3495_v50  ;;  %v1136_v6 = vpop.permute.xlu1 %1135  ;;  %3107 = vmatprep.subr.mxu1 %v3883_v1  ;;  %v1488_v50 = vld [vmem:[#allocation8] sm:$0xff] }
 0x459   : > { %v3265_v53 = vpack.c.bf16 %v1489_v51, %v1488_v50 }
 0x45a   : > { %2942 = vst.msk [vmem:[%s4366_s18 + $0x8] sm:$0xff] %vm708_vm2, %v963_v5  ;;  %3100 = vmatmul.mubr.msk.f32.vlgmr.msra.gmra.mrb[6].mxu1 %vm708_vm2, %v963_v5 }
 0x45b   : > { %3108 = vmatpush3.msra.mxu1 %v1136_v6  ;;  %3109 = vmatprep.mubr.msk.f32.mxu1 %vm3882_vm0, %v3883_v1 }
 0x45c   : > { %3117 = vmatprep.subr.mxu1 %v3883_v1 }
 0x45f   : > { %v3505_v7 = vpop.eup %3504 }
 0x460   : > { %v1301_v9 = vmul.f32 %v3505_v7, %v3497_v52  ;;  %v1490_v52 = vld [vmem:[#allocation8 + $0x10] sm:$0xff] }
 0x461   : > { %v3268_v55 = vpack.c.bf16 %v1491_v54, %v1490_v52 }
 0x462   : > { %2950 = vst.msk [vmem:[%s4366_s18 + $0x18] sm:$0xff] %vm708_vm2, %v1301_v9 }
 0x47d   : > { %v1130_v10 = vpop.xlane.xlu0 %1129 }
 0x47e   : > { %3506 = vrcp.f32 %v1130_v10 }
 0x481   : > { %v1305_v13 = vpop.permute.xlu0 %1304 }
 0x488   : > { %v3507_v11 = vpop.eup %3506 }
 0x489   : > { %v1132_v12 = vmul.f32 %v3507_v11, %v3499_v57 }
 0x48b   : > { %2946 = vst.msk [vmem:[%s4366_s18 + $0x10] sm:$0xff] %vm708_vm2, %v1132_v12  ;;  %3110 = vmatmul.mubr.msk.f32.vlgmr.msra.gmra.mrb[8].mxu1 %vm708_vm2, %v1132_v12 }
 0x48c   : > { %3118 = vmatpush3.msra.mxu1 %v1305_v13  ;;  %3119 = vmatprep.mubr.msk.f32.mxu1 %vm3882_vm0, %v3883_v1  ;;  %v4461_v13 = vld [vmem:[%s534_s19] sm:$0xff]  ;;  %s4480_s19 = scalar_lea.vmem [#allocation17], %s2932_s16 }
 0x48d   : > { %3264 = vmatprep.subr.bf16.mxu1 %v3881_v0 }
 0x48f   : > { %3120 = vmatmul.mubr.msk.f32.vlgmr.msra.gmra.mrb[10].mxu1 %vm708_vm2, %v1301_v9 }
 0x490   : > { %3141 = vmatprep.mubr.msk.f32.mxu1 %vm3882_vm0, %v3883_v1  ;;  %3266 = vmatpush3.bf16.msra.mxu1 %v3265_v53 }
 0x491   : > { %3267 = vmatprep.subr.bf16.mxu1 %v3881_v0 }
 0x494   : > { %3269 = vmatpush3.bf16.msra.mxu1 %v3268_v55 }
 0x495   : > { %3278 = vmatprep.subr.bf16.mxu1 %v3881_v0 }
 0x529   : > { %v869_v17 = vpop.f32.mrb[4].mxu1 }
 0x52a   : > { %v3091_v18 = vpop.f32.mrb[5].mxu1 }
 0x52d   : > { %v1038_v19 = vpop.f32.mrb[6].mxu1 }
 0x52e   : > { %1381 = vrot.lane.b32.xlu1 %v1038_v19, %s3895_s17  ;;  %v3101_v20 = vpop.f32.mrb[7].mxu1 }
 0x55e   : > { %v1207_v24 = vpop.f32.mrb[8].mxu1 }
 0x55f   : > { %1385 = vrot.lane.b32.xlu0 %v1207_v24, %s3896_s30  ;;  %v3111_v25 = vpop.f32.mrb[9].mxu1 }
 0x562   : > { %v1376_v26 = vpop.f32.mrb[10].mxu1 }
 0x563   : > { %1389 = vrot.lane.b32.xlu1 %v1376_v26, %s3897_s23  ;;  %v3121_v27 = vpop.f32.mrb[11].mxu1 }
 0x5a0   : > { %v1382_v28 = vpop.permute.xlu1 %1381 }
 0x5a1   : > { %v1392_v30 = vsel %vm708_vm2, %v869_v17, %v1382_v28 }
 0x5d1   : > { %v1386_v29 = vpop.permute.xlu0 %1385 }
 0x5d2   : > { %v1394_v31 = vsel %vm1393_vm3, %v1392_v30, %v1386_v29 }
 0x5d5   : > { %v1390_v32 = vpop.permute.xlu1 %1389 }
 0x5d6   : > { %v1396_v33 = vsel %vm1395_vm4, %v1394_v31, %v1390_v32 }
 0x5d7   : > { %3131 = vmatmul.mubr.msk.f32.vlgmr.msra.gmra.mrb[6].mxu0 %vm630_vm1, %v1396_v33 }
 0x5d8   : > { %3273 = vmatpush3.bf16.msra.mxu0 %v3270_v41  ;;  %3152 = vmatprep.mubr.msk.f32.mxu0 %vm630_vm1, %v624_v48 }
 0x5d9   : > { %3275 = vmatprep.subr.bf16.mxu0 %v3274_v43 }
 0x5dc   : > { %3277 = vmatpush3.bf16.msra.mxu0 %v3274_v43 }
 0x5dd   : > { %3282 = vmatprep.subr.bf16.mxu0 %v3881_v0 }
 0x5df   : > { %3153 = vmatmul.mubr.msk.f32.vlgmr.msra.gmra.mrb[8].mxu0 %vm630_vm1, %v625_v49 }
 0x5e0   : > { %3166 = vmatprep.mubr.msk.f32.mxu0 %vm3882_vm0, %v3883_v1 }
 0x6aa   : > { %v1470_v34 = vpop.f32.mrb[6].mxu0 }
 0x6ab   : > { %v1471_v35 = vadd.f32 %v1470_v34, %v4304_v8  ;;  %v3132_v36 = vpop.f32.mrb[7].mxu0 }
 0x6ad   : > { %v1474_v37 = vsel %vm630_vm1, %v1471_v35, 0.0 }
 0x6ae   : > { %1475 = vadd.xlane.f32.xlu0 %v1474_v37 }
 0x6b2   : > { %v3154_v61 = vpop.f32.mrb[8].mxu0 }
 0x6b3   : > { %v1641_v62 = vpop.f32.mrb[9].mxu0 }
 0x6b4   : > { %v4438_v2 = vpack.i.bf16 %v3154_v61, %v1641_v62  ;;  %v3279_v3 = vpack.c.bf16 %v3154_v61, %v1641_v62 }
 0x6c4   : > { %3458 = vrot.lane.b32.xlu0 %v4438_v2, %s3884_s21 }
 0x73b   : > { %v1476_v44 = vpop.xlane.xlu0 %1475 }
 0x73c   : > { %v1478_v8 = vmul.f32 0.03125, %v1476_v44 }
 0x73e   : > { %v1479_v45 = vsub.f32 %v1471_v35, %v1478_v8 }
 0x73f   : > { %v3459_v4 = vpop.permute.xlu0 %3458 }
 0x740   : > { %v1480_v46 = vmul.f32 %v1479_v45, %v1479_v45  ;;  %v3461_v5 = vunpack.i.h.bf16 %v3459_v4  ;;  %v3460_v6 = vunpack.i.l.bf16 %v3459_v4 }
 0x742   : > { %v1481_v47 = vsel %vm630_vm1, %v1480_v46, 0.0  ;;  %v3286_v7 = vpack.c.bf16 %v3461_v5, %v3460_v6 }
 0x743   : > { %1482 = vadd.xlane.f32.xlu1 %v1481_v47 }
 0x7d0   : > { %v1483_v56 = vpop.xlane.xlu1 %1482 }
 0x7d1   : > { %v1484_v57 = vmul.f32 0.03125, %v1483_v56 }
 0x7d3   : > { %v1485_v58 = vadd.f32 1e-05, %v1484_v57 }
 0x7d5   : > { %3508 = vrsqrt.f32 %v1485_v58 }
 0x7df   : > { %v3509_v59 = vpop.eup %3508 }
 0x7e0   : > { %v4426_v60 = vmul.f32 %v3509_v59, %v1479_v45 }
 0x7e2   : > { %3142 = vmatmul.mubr.msk.f32.vlgmr.msra.gmra.mrb[12].mxu1 %vm630_vm1, %v4426_v60 }
 0x7e3   : > { %3159 = vmatprep.mubr.msk.f32.mxu1 %vm3882_vm0, %v3883_v1  ;;  %3281 = vmatpush3.bf16.xpose.msk.msra.mxu1 %vm4434_vm5, %v3279_v3 }
 0x7e4   : > { %3285 = vmatprep.subr.bf16.mxu1 %v3881_v0 }
 0x8b5   : > { %v4445_v9 = vpop.f32.mrb[12].mxu1 }
 0x8b6   : > { %1823 = vrot.lane.b32.xlu1 %v4445_v9, %s3884_s21  ;;  %v3143_v10 = vpop.f32.mrb[13].mxu1  ;;  %3160 = vmatmul.mubr.msk.f32.vlgmr.msra.gmra.mrb[14].mxu1 %vm708_vm2, %v4445_v9 }
 0x8b7   : > { %3288 = vmatpush3.bf16.xpose.msk.msra.mxu1 %vm4434_vm5, %v3286_v7  ;;  %3173 = vmatprep.mubr.msk.f32.mxu1 %vm3882_vm0, %v3883_v1 }
 0x8b8   : > { %3296 = vmatprep.subr.bf16.mxu1 %v3881_v0 }
 0x928   : > { %v1824_v11 = vpop.permute.xlu1 %1823 }
 0x929   : > { %3174 = vmatmul.mubr.msk.f32.vlgmr.msra.gmra.mrb[16].mxu1 %vm708_vm2, %v1824_v11 }
 0x92a   : > { %3194 = vmatprep.mubr.msk.f32.mxu1 %vm3882_vm0, %v3883_v1 }
 0x989   : > { %v1726_v12 = vpop.f32.mrb[14].mxu1 }
 0x98a   : > { %v1730_v14 = vmul.f32 0.35355338, %v1726_v12  ;;  %v3161_v15 = vpop.f32.mrb[15].mxu1 }
 0x98c   : > { %v1731_v16 = vadd.f32 %v1730_v14, %v4461_v13 }
 0x98e   : > { %v1732_v17 = vsel %vm1393_vm3, %v1731_v16, -inf }
 0x98f   : > { %1733 = vmax.xlane.f32.xlu0 %v1732_v17 }
 0x9fc   : > { %v1901_v18 = vpop.f32.mrb[16].mxu1 }
 0x9fd   : > { %v1905_v19 = vmul.f32 0.35355338, %v1901_v18  ;;  %v3175_v20 = vpop.f32.mrb[17].mxu1 }
 0x9ff   : > { %v1906_v21 = vadd.f32 %v1905_v19, %v4461_v13 }
 0xa01   : > { %v1907_v22 = vsel %vm1393_vm3, %v1906_v21, -inf }
 0xa02   : > { %1908 = vmax.xlane.f32.xlu1 %v1907_v22 }
 0xa13   : > { %3463 = vrot.lane.b32.xlu1 %v4438_v2, %s3885_s28  ;;  %s4801_s28 = sld [smem:[#allocation28_spill]] }
 0xa17   : > { %3473 = vrot.lane.b32.xlu1 %v4438_v2, %s3889_s25 }
 0xa19   : > { %p4803_p11 = scmp.ne.s32.totalorder %s4801_s28, 0 }
 0xa1b   : > { %1999 = vrot.lane.b32.xlu1 %v4445_v9, %s3889_s25 }
 0xa1c   : > { %v1734_v23 = vpop.xlane.xlu0 %1733 }
 0xa1d   : > { %v1735_v24 = vsub.f32 %v1731_v16, %v1734_v23 }
 0xa1f   : > { %v1736_v25 = vmul.f32 1.442695, %v1735_v24 }
 0xa21   : > { %3510 = vpow2.f32 %v1736_v25 }
 0xa2b   : > { %v3511_v26 = vpop.eup %3510 }
 0xa2c   : > { %v1738_v27 = vsel %vm1393_vm3, %v3511_v26, 0.0 }
 0xa2d   : > { %1739 = vadd.xlane.f32.xlu0 %v1738_v27 }
 0xa8f   : > { %v1909_v28 = vpop.xlane.xlu1 %1908 }
 0xa90   : > { %v1910_v29 = vsub.f32 %v1906_v21, %v1909_v28 }
 0xa92   : > { %v1911_v30 = vmul.f32 1.442695, %v1910_v29 }
 0xa93   : > { %v3464_v31 = vpop.permute.xlu1 %3463 }
 0xa94   : > { %3512 = vpow2.f32 %v1911_v30  ;;  %v3466_v32 = vunpack.i.h.bf16 %v3464_v31  ;;  %v3465_v33 = vunpack.i.l.bf16 %v3464_v31 }
 0xa96   : > { %v3283_v34 = vpack.c.bf16 %v3466_v32, %v3465_v33 }
 0xa97   : > { %v3474_v8 = vpop.permute.xlu1 %3473 }
 0xa98   : > { %3284 = vmatpush3.bf16.msra.mxu0 %v3283_v34  ;;  %v3476_v46 = vunpack.i.h.bf16 %v3474_v8  ;;  %v3475_v47 = vunpack.i.l.bf16 %v3474_v8 }
 0xa99   : > { %3289 = vmatprep.subr.bf16.mxu0 %v3881_v0 }
 0xa9a   : > { %v3293_v49 = vpack.c.bf16 %v3476_v46, %v3475_v47 }
 0xa9b   : > { %v2000_v50 = vpop.permute.xlu1 %1999 }
 0xa9e   : > { %v3513_v35 = vpop.eup %3512 }
 0xa9f   : > { %v1913_v36 = vsel %vm1393_vm3, %v3513_v35, 0.0 }
 0xaa0   : > { %1914 = vadd.xlane.f32.xlu0 %v1913_v36 }
 0xab6   : > { %3468 = vrot.lane.b32.xlu0 %v4438_v2, %s3887_s10  ;;  %s2989_s10 = sshll.u32 %s3993_s14, 9 }
 0xaba   : > { %v1740_v37 = vpop.xlane.xlu0 %1739 }
 0xabb   : > { %3514 = vrcp.f32 %v1740_v37  ;;  %v2366_v37 = vld [vmem:[#allocation11] sm:$0xff] }
 0xac5   : > { %v3515_v38 = vpop.eup %3514 }
 0xac6   : > { %v1742_v39 = vmul.f32 %v3515_v38, %v3511_v26  ;;  %v2368_v38 = vld [vmem:[#allocation11 + $0x10] sm:$0xff] }
 0xac8   : > { %1743 = vst.msk [vmem:[%s4480_s19] sm:$0xff] %vm1393_vm3, %v1742_v39  ;;  %3167 = vmatmul.mubr.msk.f32.vlgmr.msra.gmra.mrb[10].mxu0 %vm1393_vm3, %v1742_v39 }
 0xac9   : > { %3180 = vmatprep.mubr.msk.f32.mxu0 %vm3882_vm0, %v3883_v1 }
 0xb2d   : > { %v1915_v40 = vpop.xlane.xlu0 %1914 }
 0xb2e   : > { %3516 = vrcp.f32 %v1915_v40  ;;  %v2369_v40 = vld [vmem:[#allocation11 + $0x18] sm:$0xff] }
 0xb31   : > { %v3469_v41 = vpop.permute.xlu0 %3468 }
 0xb32   : > { %v3471_v42 = vunpack.i.h.bf16 %v3469_v41  ;;  %v3470_v43 = vunpack.i.l.bf16 %v3469_v41  ;;  %v3310_v41 = vpack.c.bf16 %v2369_v40, %v2368_v38 }
 0xb34   : > { %v3290_v44 = vpack.c.bf16 %v3471_v42, %v3470_v43 }
 0xb36   : > { %3291 = vmatpush3.bf16.msra.mxu0 %v3290_v44 }
 0xb37   : > { %3292 = vmatprep.subr.bf16.mxu0 %v3881_v0 }
 0xb38   : > { %v3517_v45 = vpop.eup %3516 }
 0xb39   : > { %v1917_v48 = vmul.f32 %v3517_v45, %v3513_v35 }
 0xb3b   : > { %2963 = vst.msk [vmem:[%s4480_s19 + $0x8] sm:$0xff] %vm1393_vm3, %v1917_v48  ;;  %3181 = vmatmul.mubr.msk.f32.vlgmr.msra.gmra.mrb[12].mxu0 %vm1393_vm3, %v1917_v48 }
 0xb3c   : > { %3187 = vmatprep.mubr.msk.f32.mxu0 %vm3882_vm0, %v3883_v1 }
 0xb3f   : > { %3295 = vmatpush3.bf16.xpose.msk.msra.mxu0 %vm4434_vm5, %v3293_v49 }
 0xb40   : > { %3303 = vmatprep.subr.bf16.mxu0 %v3881_v0 }
 0xb46   : > { %3188 = vmatmul.mubr.msk.f32.vlgmr.msra.gmra.mrb[14].mxu0 %vm708_vm2, %v2000_v50 }
 0xb47   : > { %3208 = vmatprep.mubr.msk.f32.mxu0 %vm3882_vm0, %v3883_v1 }
 0xb9b   : > { %v4499_v51 = vpop.f32.mrb[10].mxu0 }
 0xb9c   : > { %v3168_v52 = vpop.f32.mrb[11].mxu0 }
 0xc0e   : > { %v1995_v53 = vpop.f32.mrb[12].mxu0 }
 0xc0f   : > { %v3182_v54 = vpop.f32.mrb[13].mxu0 }
 0xc19   : > { %v2077_v55 = vpop.f32.mrb[14].mxu0 }
 0xc1a   : > { %v2081_v56 = vmul.f32 0.35355338, %v2077_v55  ;;  %v3189_v57 = vpop.f32.mrb[15].mxu0 }
 0xc1c   : > { %v2082_v58 = vadd.f32 %v2081_v56, %v4461_v13 }
 0xc1e   : > { %v2083_v59 = vsel %vm1393_vm3, %v2082_v58, -inf }
 0xc1f   : > { %2084 = vmax.xlane.f32.xlu0 %v2083_v59  ;;  %v2457_v59 = vld [vmem:[#allocation13 + $0x8] sm:$0xff] }
 0xc35   : > { %3478 = vrot.lane.b32.xlu0 %v4438_v2, %s3886_s12  ;;  %s4800_s12 = sld [smem:[#allocation35_spill]] }
 0xc39   : > { %2175 = vrot.lane.b32.xlu0 %v4445_v9, %s3890_s29 }
 0xcac   : > { %v2085_v61 = vpop.xlane.xlu0 %2084 }
 0xcad   : > { %v2086_v62 = vsub.f32 %v2082_v58, %v2085_v61  ;;  %v2456_v58 = vld [vmem:[#allocation13] sm:$0xff]  ;;  %v2458_v61 = vld [vmem:[#allocation13 + $0x10] sm:$0xff] }
 0xcaf   : > { %v2087_v3 = vmul.f32 1.442695, %v2086_v62  ;;  %v3313_v62 = vpack.c.bf16 %v2457_v59, %v2456_v58 }
 0xcb0   : > { %v3479_v4 = vpop.permute.xlu0 %3478 }
 0xcb1   : > { %3518 = vpow2.f32 %v2087_v3  ;;  %v3481_v5 = vunpack.i.h.bf16 %v3479_v4  ;;  %v3480_v6 = vunpack.i.l.bf16 %v3479_v4  ;;  %v2459_v3 = vld [vmem:[#allocation13 + $0x18] sm:$0xff] }
 0xcb2   : > { %v2535_v4 = vld [vmem:[%s4800_s12 + $0x8] sm:$0xff] }
 0xcb3   : > { %v3297_v7 = vpack.c.bf16 %v3481_v5, %v3480_v6  ;;  %v2536_v5 = vld [vmem:[%s4800_s12 + $0x10] sm:$0xff] }
 0xcb4   : > { %v2176_v19 = vpop.permute.xlu0 %2175 }
 0xcb5   : > { %3298 = vmatpush3.bf16.msra.mxu1 %v3297_v7  ;;  %v2537_v7 = vld [vmem:[%s4800_s12 + $0x18] sm:$0xff] }
 0xcb6   : > { %3299 = vmatprep.subr.bf16.mxu1 %v3881_v0 }
 0xcbb   : > { %v3519_v10 = vpop.eup %3518 }
 0xcbc   : > { %v2089_v11 = vsel %vm1393_vm3, %v3519_v10, 0.0 }
 0xcbd   : > { %2090 = vadd.xlane.f32.xlu1 %v2089_v11  ;;  %v2538_v11 = vld [vmem:[%s4800_s12 + $0x20] sm:$0xff] }
 0xcce   : > { %3483 = vrot.lane.b32.xlu1 %v4438_v2, %s3890_s29  ;;  %s4802_s29 = sld [smem:[#allocation37_spill]] }
 0xcd4   : > { %s4589_s16 = scalar_lea.hbm %s4802_s29, %s2989_s10 }
 0xd4a   : > { %v2091_v9 = vpop.xlane.xlu1 %2090 }
 0xd4b   : > { %3520 = vrcp.f32 %v2091_v9  ;;  %v2539_v9 = vld [vmem:[%s4800_s12 + $0x28] sm:$0xff] }
 0xd4e   : > { %v3484_v12 = vpop.permute.xlu1 %3483 }
 0xd4f   : > { %v3486_v14 = vunpack.i.h.bf16 %v3484_v12  ;;  %v3485_v15 = vunpack.i.l.bf16 %v3484_v12  ;;  %v3325_v12 = vpack.c.bf16 %v2539_v9, %v2538_v11 }
 0xd51   : > { %v3300_v18 = vpack.c.bf16 %v3486_v14, %v3485_v15 }
 0xd55   : > { %v3521_v16 = vpop.eup %3520 }
 0xd56   : > { %v2093_v17 = vmul.f32 %v3521_v16, %v3519_v10  ;;  %v3322_v10 = vpack.c.bf16 %v2537_v7, %v2536_v5 }
 0xd58   : > { %2968 = vst.msk [vmem:[%s4480_s19 + $0x10] sm:$0xff] %vm1393_vm3, %v2093_v17  ;;  %3195 = vmatmul.mubr.msk.f32.vlgmr.msra.gmra.mrb[18].mxu1 %vm1393_vm3, %v2093_v17 }
 0xd59   : > { %3302 = vmatpush3.bf16.xpose.msk.msra.mxu1 %vm4434_vm5, %v3300_v18  ;;  %3201 = vmatprep.mubr.msk.f32.mxu1 %vm3882_vm0, %v3883_v1 }
 0xd5a   : > { %3312 = vmatprep.subr.bf16.mxu1 %v3881_v0 }
 0xd60   : > { %3202 = vmatmul.mubr.msk.f32.vlgmr.msra.gmra.mrb[20].mxu1 %vm708_vm2, %v2176_v19  ;;  %v2540_v19 = vld [vmem:[%s4800_s12 + $0x30] sm:$0xff] }
 0xd61   : > { %3230 = vmatprep.mubr.msk.f32.mxu1 %vm3882_vm0, %v3883_v1  ;;  %3314 = vmatpush3.bf16.msra.mxu1 %v3313_v62 }
 0xd62   : > { %3315 = vmatprep.subr.bf16.mxu1 %v3881_v0 }
 0xe2b   : > { %v2171_v20 = vpop.f32.mrb[18].mxu1 }
 0xe2c   : > { %v3196_v21 = vpop.f32.mrb[19].mxu1 }
 0xe33   : > { %v2253_v22 = vpop.f32.mrb[20].mxu1 }
 0xe34   : > { %v2257_v23 = vmul.f32 0.35355338, %v2253_v22  ;;  %v3203_v24 = vpop.f32.mrb[21].mxu1 }
 0xe36   : > { %v2258_v25 = vadd.f32 %v2257_v23, %v4461_v13 }
 0xe38   : > { %v2259_v63 = vsel %vm1393_vm3, %v2258_v25, -inf }
 0xe39   : > { %2260 = vmax.xlane.f32.xlu1 %v2259_v63 }
 0xe4a   : > { %2352 = vrot.lane.b32.xlu1 %v1995_v53, %s3895_s17 }
 0xe4e   : > { %2356 = vrot.lane.b32.xlu1 %v2171_v20, %s3896_s30  ;;  %v2541_v20 = vld [vmem:[%s4800_s12 + $0x38] sm:$0xff]  ;;  %s2667_s30 = sshll.u32 %s4366_s18, 4  ;;  %s4592_s30 = int_to_ptr.vmem [resolvable:$true] %s2667_s30 }
 0xe4f   : > { %v3328_v21 = vpack.c.bf16 %v2541_v20, %v2540_v19  ;;  %s3732_s6 = scalar_lea.vmem %s4592_s30, 512  ;;  %p3739_p5 = scmp.lt.s32.totalorder %s4592_s30, %s3737_s5 }
 0xe50   : > { %p3733_p13 = scmp.ne.s32.totalorder %s4592_s30, %s3732_s6  ;;  %p3740_p2 = scmp.lt.s32.totalorder %s3738_s24, %s3732_s6 }
 0xe52   : > { %p3734_p1 = pnand %p3733_p13, %p4803_p11  ;;  %p3741_p4 = por %p3740_p2, %p3739_p5 }
 0xe54   : > { %p3735_p6 = pneg %p3734_p1 }
 0xe56   : > { %p3742_p10 = pnand %p3741_p4, %p3735_p6 }
 0xec6   : > { %v2261_v26 = vpop.xlane.xlu1 %2260 }
 0xec7   : > { %v2262_v27 = vsub.f32 %v2258_v25, %v2261_v26 }
 0xec9   : > { %v2263_v28 = vmul.f32 1.442695, %v2262_v27 }
 0xeca   : > { %v2353_v44 = vpop.permute.xlu1 %2352 }
 0xecb   : > { %3522 = vpow2.f32 %v2263_v28  ;;  %v2363_v45 = vsel %vm708_vm2, %v4499_v51, %v2353_v44 }
 0xece   : > { %v2357_v8 = vpop.permute.xlu1 %2356 }
 0xecf   : > { %v2364_v46 = vsel %vm1393_vm3, %v2363_v45, %v2357_v8 }
 0xed5   : > { %v3523_v29 = vpop.eup %3522 }
 0xed6   : > { %v2265_v30 = vsel %vm1393_vm3, %v3523_v29, 0.0 }
 0xed7   : > { %2266 = vadd.xlane.f32.xlu0 %v2265_v30 }
 0xeed   : > { %3488 = vrot.lane.b32.xlu0 %v4438_v2, %s3888_s11  ;;  %v2367_v2 = vld [vmem:[#allocation11 + $0x8] sm:$0xff] }
 0xeee   : > { %v3307_v39 = vpack.c.bf16 %v2367_v2, %v2366_v37 }
 0xf64   : > { %v2267_v13 = vpop.xlane.xlu0 %2266 }
 0xf65   : > { %3524 = vrcp.f32 %v2267_v13 }
 0xf68   : > { %v3489_v31 = vpop.permute.xlu0 %3488 }
 0xf69   : > { %v3491_v32 = vunpack.i.h.bf16 %v3489_v31  ;;  %v3490_v33 = vunpack.i.l.bf16 %v3489_v31 }
 0xf6b   : > { %v3304_v34 = vpack.c.bf16 %v3491_v32, %v3490_v33 }
 0xf6d   : > { %3305 = vmatpush3.bf16.msra.mxu0 %v3304_v34 }
 0xf6e   : > { %3306 = vmatprep.subr.bf16.mxu0 %v3881_v0 }
 0xf6f   : > { %v3525_v35 = vpop.eup %3524 }
 0xf70   : > { %v2269_v36 = vmul.f32 %v3525_v35, %v3523_v29 }
 0xf72   : > { %2973 = vst.msk [vmem:[%s4480_s19 + $0x18] sm:$0xff] %vm1393_vm3, %v2269_v36  ;;  %3209 = vmatmul.mubr.msk.f32.vlgmr.msra.gmra.mrb[16].mxu0 %vm1393_vm3, %v2269_v36 }
 0xf73   : > { %3219 = vmatprep.mubr.msk.f32.mxu0 %vm3882_vm0, %v3883_v1  ;;  %3308 = vmatpush3.bf16.msra.mxu0 %v3307_v39 }
 0xf74   : > { %3309 = vmatprep.subr.bf16.mxu0 %v3881_v0 }
 0xf77   : > { %3311 = vmatpush3.bf16.msra.mxu0 %v3310_v41 }
 0xf78   : > { %3318 = vmatprep.subr.bf16.mxu0 %v3881_v0 }
0x1045   : > { %v2347_v42 = vpop.f32.mrb[16].mxu0 }
0x1046   : > { %2360 = vrot.lane.b32.xlu0 %v2347_v42, %s3897_s23  ;;  %v3210_v43 = vpop.f32.mrb[17].mxu0  ;;  %s4596_s23 = scalar_lea.sflag [#allocation16], %s521_s15 }
0x10b8   : > { %v2361_v47 = vpop.permute.xlu0 %2360 }
0x10b9   : > { %v2365_v48 = vsel %vm1395_vm4, %v2364_v46, %v2361_v47 }
0x10ba   : > { %3220 = vmatmul.mubr.msk.f32.vlgmr.msra.gmra.mrb[18].mxu0 %vm630_vm1, %v2365_v48 }
0x10bb   : > { %3249 = vmatprep.mubr.msk.f32.mxu0 %vm3882_vm0, %v3883_v1  ;;  %v3316_v1 = vpack.c.bf16 %v2459_v3, %v2458_v61 }
0x10bd   : > { %3317 = vmatpush3.bf16.msra.mxu1 %v3316_v1 }
0x118d   : > { %v2439_v49 = vpop.f32.mrb[18].mxu0 }
0x118e   : > { %v2440_v50 = vadd.f32 %v2439_v49, %v4426_v60  ;;  %v3221_v52 = vpop.f32.mrb[19].mxu0  ;;  %v2534_v60 = vld [vmem:[%s4800_s12] sm:$0xff] }
0x118f   : > { %v3319_v6 = vpack.c.bf16 %v2535_v4, %v2534_v60 }
0x1190   : > { %v2443_v53 = vsel %vm630_vm1, %v2440_v50, 0.0 }
0x1191   : > { %2444 = vadd.xlane.f32.xlu1 %v2443_v53  ;;  %3320 = vmatpush3.bf16.msra.mxu0 %v3319_v6 }
0x1192   : > { %3321 = vmatprep.subr.bf16.mxu0 %v3881_v0 }
0x1195   : > { %3323 = vmatpush3.bf16.msra.mxu0 %v3322_v10 }
0x1196   : > { %3324 = vmatprep.subr.bf16.mxu0 %v3881_v0 }
0x1199   : > { %3326 = vmatpush3.bf16.msra.mxu0 %v3325_v12 }
0x119a   : > { %3327 = vmatprep.subr.bf16.mxu0 %v3881_v0 }
0x119d   : > { %3329 = vmatpush3.bf16.msra.mxu0 %v3328_v21 }
0x121e   : > { %v2445_v54 = vpop.xlane.xlu1 %2444 }
0x121f   : > { %v2446_v55 = vmul.f32 0.03125, %v2445_v54 }
0x1221   : > { %v2447_v51 = vsub.f32 %v2440_v50, %v2446_v55 }
0x1223   : > { %v2448_v56 = vmul.f32 %v2447_v51, %v2447_v51 }
0x1225   : > { %v2449_v57 = vsel %vm630_vm1, %v2448_v56, 0.0 }
0x1226   : > { %2450 = vadd.xlane.f32.xlu0 %v2449_v57 }
0x12b3   : > { %v2451_v14 = vpop.xlane.xlu0 %2450 }
0x12b4   : > { %v2452_v15 = vmul.f32 0.03125, %v2451_v14 }
0x12b6   : > { %v2453_v16 = vadd.f32 1e-05, %v2452_v15 }
0x12b8   : > { %3526 = vrsqrt.f32 %v2453_v16 }
0x12c2   : > { %v3527_v17 = vpop.eup %3526 }
0x12c3   : > { %v2455_v18 = vmul.f32 %v3527_v17, %v2447_v51 }
0x12c5   : > { %3231 = vmatmul.mubr.msk.f32.vlgmr.msra.gmra.mrb[22].mxu1 %vm630_vm1, %v2455_v18 }
0x1398   : > { %v2529_v22 = vpop.f32.mrb[22].mxu1 }
0x1399   : > { %v2533_v0 = vmax.f32 %v2529_v22, 0.0  ;;  %v3232_v23 = vpop.f32.mrb[23].mxu1 }
0x139b   : > { %3250 = vmatmul.mubr.msk.f32.vlgmr.msra.gmra.mrb[20].mxu0 %vm2542_vm6, %v2533_v0 }
0x146e   : > { %v2612_v24 = vpop.f32.mrb[20].mxu0 }
0x146f   : > { %v2613_v25 = vadd.f32 %v2612_v24, %v2455_v18  ;;  %v3251_v63 = vpop.f32.mrb[21].mxu0 }
0x1471   : > { %v2616_v26 = vsel %vm630_vm1, %v2613_v25, 0.0 }
0x1472   : > { %2617 = vadd.xlane.f32.xlu0 %v2616_v26 }
0x14ff   : > { %v2618_v27 = vpop.xlane.xlu0 %2617 }
0x1500   : > { %v2619_v28 = vmul.f32 0.03125, %v2618_v27 }
0x1502   : > { %v4578_v29 = vsub.f32 %v2613_v25, %v2619_v28 }
0x1504   : > { %v2621_v30 = vmul.f32 %v4578_v29, %v4578_v29 }
0x1506   : > { %v2622_v13 = vsel %vm630_vm1, %v2621_v30, 0.0 }
0x1507   : > { %2623 = vadd.xlane.f32.xlu1 %v2622_v13 }
0x1508   : > { %3745 = shalt.err (!%p3742_p10)
}
0x1509   : > { %s3746_s15 = scalar_lea.hbm %s4589_s16, 512  ;;  %s3750_s22 = scalar_lea.hbm %s4802_s29, 1024 }
0x150a   : > { %p3747_p3 = scmp.ne.s32.totalorder %s4589_s16, %s3746_s15  ;;  %p3751_p0 = scmp.lt.u32.totalorder %s4589_s16, %s4802_s29 }
0x150b   : > { %p3752_p7 = scmp.lt.u32.totalorder %s3750_s22, %s3746_s15  ;;  %p3754_p13 = scmp.lt.u32.totalorder %s3746_s15, %s4589_s16 }
0x150c   : > { %p3748_p8 = pnand %p3747_p3, %p4803_p11 }
0x150d   : > { %p3753_p9 = por %p3752_p7, %p3751_p0 }
0x150e   : > { %p3749_p12 = pneg %p3748_p8 }
0x150f   : > { %p3755_p1 = por %p3754_p13, %p3753_p9 }
0x1511   : > { %p3756_p6 = pnand %p3755_p1, %p3749_p12 }
0x1513   : > { %3759 = shalt.err (!%p3756_p6)
}
0x1514   : > { %s3899_s25 = smov 128   ;;  %s4804_s5 = sld [smem:[#allocation38_spill]] }
0x1515   : > { %3353 = dma.vmem_to_hbm [thread:$0]  (%p4803_p11), %s4592_s30, 512, %s4589_s16, %s4596_s23, %s3899_s25, %s3899_s25, %s3895_s17  }
0x1516   : > { %s2683_s15 = sshll.u32 %s4480_s19, 4  ;;  %s3900_s13 = smov [#allocation17]   ;;  %s4631_s15 = int_to_ptr.vmem [resolvable:$true] %s2683_s15 }
0x1517   : > { %s3760_s18 = scalar_lea.vmem %s4631_s15, 512  ;;  %s3764_s22 = sshll.u32 %s3900_s13, 4  ;;  %s3765_s22 = int_to_ptr.vmem [resolvable:$false] %s3764_s22 }
0x1518   : > { %p3761_p5 = scmp.ne.s32.totalorder %s4631_s15, %s3760_s18  ;;  %s3766_s16 = scalar_lea.vmem %s3765_s22, 1024 }
0x1519   : > { %p3767_p10 = scmp.lt.s32.totalorder %s4631_s15, %s3765_s22  ;;  %p3768_p3 = scmp.lt.s32.totalorder %s3766_s16, %s3760_s18 }
0x151a   : > { %s4628_s24 = scalar_lea.hbm %s4804_s5, %s2989_s10  ;;  %p3762_p2 = pnand %p3761_p5, %p4803_p11 }
0x151b   : > { %p3769_p8 = por %p3768_p3, %p3767_p10 }
0x151c   : > { %p3763_p4 = pneg %p3762_p2 }
0x151e   : > { %p3770_p12 = pnand %p3769_p8, %p3763_p4 }
0x1520   : > { %3773 = shalt.err (!%p3770_p12)
}
0x1521   : > { %s3774_s19 = scalar_lea.hbm %s4628_s24, 512  ;;  %s3778_s21 = scalar_lea.hbm %s4804_s5, 1024 }
0x1522   : > { %p3775_p0 = scmp.ne.s32.totalorder %s4628_s24, %s3774_s19  ;;  %p3779_p13 = scmp.lt.u32.totalorder %s4628_s24, %s4804_s5 }
0x1523   : > { %p3780_p1 = scmp.lt.u32.totalorder %s3778_s21, %s3774_s19  ;;  %p3782_p5 = scmp.lt.u32.totalorder %s3774_s19, %s4628_s24 }
0x1524   : > { %p3776_p7 = pnand %p3775_p0, %p4803_p11 }
0x1525   : > { %p3781_p6 = por %p3780_p1, %p3779_p13 }
0x1526   : > { %p3777_p9 = pneg %p3776_p7 }
0x1527   : > { %p3783_p2 = por %p3782_p5, %p3781_p6 }
0x1529   : > { %p3784_p4 = pnand %p3783_p2, %p3777_p9 }
0x152b   : > { %3787 = shalt.err (!%p3784_p4)
}
0x152c   : > { %3354 = dma.vmem_to_hbm [thread:$0]  (%p4803_p11), %s4631_s15, 512, %s4628_s24, %s4596_s23, %s3899_s25, %s3899_s25, %s3895_s17  }
0x152d   : > { %s2981_s8 = sshll.u32 %s3993_s14, 7  ;;  %s603_s18 = scalar_lea.vmem [#allocation14], %s4260_s1 }
0x152e   : > { %s2654_s13 = sshll.u32 %s603_s18, 4  ;;  %s4805_s19 = sld [smem:[#allocation36_spill]]  ;;  %s4666_s13 = int_to_ptr.vmem [resolvable:$true] %s2654_s13 }
0x152f   : > { %s2631_s17 = scalar_lea.sflag [#allocation4], %s4257_s20  ;;  %s3788_s23 = scalar_lea.vmem %s4666_s13, 128 }
0x1530   : > { %p3789_p10 = scmp.ne.s32.totalorder %s4666_s13, %s3788_s23  ;;  %s3901_s14 = smov [#allocation14]  }
0x1531   : > { %s3792_s1 = sshll.u32 %s3901_s14, 4  ;;  %s3793_s1 = int_to_ptr.vmem [resolvable:$false] %s3792_s1 }
0x1532   : > { %p3790_p3 = pnand %p3789_p10, %p4803_p11  ;;  %s3794_s25 = scalar_lea.vmem %s3793_s1, 256 }
0x1533   : > { %p3795_p12 = scmp.lt.s32.totalorder %s4666_s13, %s3793_s1  ;;  %p3796_p0 = scmp.lt.s32.totalorder %s3794_s25, %s3788_s23 }
0x1534   : > { %s4664_s10 = scalar_lea.hbm %s4805_s19, %s2981_s8  ;;  %p3791_p8 = pneg %p3790_p3 }
0x1535   : > { %p3797_p7 = por %p3796_p0, %p3795_p12 }
0x1537   : > { %p3798_p9 = pnand %p3797_p7, %p3791_p8 }
0x1594   : > { %v2624_v31 = vpop.xlane.xlu1 %2623 }
0x1595   : > { %v2625_v32 = vmul.f32 0.03125, %v2624_v31 }
0x1597   : > { %v2626_v33 = vadd.f32 1e-05, %v2625_v32 }
0x1599   : > { %3528 = vrsqrt.f32 %v2626_v33 }
0x15a3   : > { %v3529_v34 = vpop.eup %3528 }
0x15a4   : > { %v2628_v35 = vmul.f32 %v3529_v34, %v4578_v29 }
0x15a6   : > { %2629 = vst.msk [vmem:[%s603_s18] sm:$0xff] %vm630_vm1, %v2628_v35 }
0x15a7   : > { %3801 = shalt.err (!%p3798_p9)
}
0x15a8   : > { %s3802_s20 = scalar_lea.hbm %s4664_s10, 128  ;;  %s3806_s30 = scalar_lea.hbm %s4805_s19, 256 }
0x15a9   : > { %p3803_p13 = scmp.ne.s32.totalorder %s4664_s10, %s3802_s20  ;;  %p3807_p5 = scmp.lt.u32.totalorder %s4664_s10, %s4805_s19 }
0x15aa   : > { %p3808_p2 = scmp.lt.u32.totalorder %s3806_s30, %s3802_s20  ;;  %p3810_p10 = scmp.lt.u32.totalorder %s3802_s20, %s4664_s10 }
0x15ab   : > { %p3804_p1 = pnand %p3803_p13, %p4803_p11 }
0x15ac   : > { %p3809_p4 = por %p3808_p2, %p3807_p5 }
0x15ad   : > { %p3805_p6 = pneg %p3804_p1 }
0x15ae   : > { %p3811_p3 = por %p3810_p10, %p3809_p4 }
0x15b0   : > { %p3812_p8 = pnand %p3811_p3, %p3805_p6 }
0x15b2   : > { %3815 = shalt.err (!%p3812_p8)
}
0x15b3   : > { %3352 = dma.vmem_to_hbm [thread:$0]  (%p4803_p11), %s4666_s13, 128, %s4664_s10, %s2631_s17  }
0x15b4 PF: > { %s4806_s6 = sld [smem:[#allocation24_spill]]  ;;  %s4807_s8 = sld [smem:[#allocation29_spill]] }
0x15b5   : > { %s4808_s18 = sld [smem:[#allocation25_spill]] }
0x15ba   : > { %s2698_s22 = sand.u32 1, %s4806_s6   ;;  %p4809_p12 = scmp.ne.s32.totalorder %s4807_s8, 0 }
0x15bb   : > { %p4810_p0 = scmp.ge.s32.totalorder %s4808_s18, 2  ;;  %s2699_s16 = scalar_lea.sflag [#allocation4], %s2698_s22 }
0x15bd   : > { %p3382_p7 = pnand %p4810_p0, %p4809_p12 }
0x15bf   : > { %3849 = dma.done.wait (!%p3382_p7), %s2699_s16, 128  }
0x15c0   : > { %3851 = vsyncadd (!%p3382_p7), %s2699_s16, 4294967168  ;;  %s4811_s23 = sadd.s32 4294967294, %s4808_s18  }
0x15c1   : > { %s2707_s14 = sand.u32 1, %s4811_s23  }
0x15c2   : > { %s2708_s1 = scalar_lea.sflag [#allocation16], %s2707_s14 }
0x15c3   : > { %3853 = dma.done.wait (!%p3382_p7), %s2708_s1, 1024  }
0x15c4   : > { %3855 = vsyncadd (!%p3382_p7), %s2708_s1, 4294966272  ;;  %s4812_s28 = sld [smem:[#allocation26_spill]]  ;;  %s4813_s13 = sld [smem:[#allocation27_spill]] }
0x15c5   : > { %s4814_s25 = smov %s3862_s26  ;;  %s4815_s26 = smov %s3866_s27 }
0x15ca   : > { %p35_p11 = scmp.ge.s32.totalorder %s4812_s28, 4   ;;  %s4816_s27 = smov %s4813_s13 }
0x15cc   :  { %37 = sbr.rel (!%p35_p11) target bundleno = 21 (0x15), region = 190 }
0x15d3   :  { %2722 = vsyncpa [#allocation3], 1 }
0x15d4   :  { %2724 = vsyncpa [#allocation3 + $0x1], 1 }
0x15d5   :  { %2725 = vsyncpa [#allocation6], 1 }
0x15d6   :  { %2727 = vsyncpa [#allocation6 + $0x1], 1 }
0x15d7   :  { %2728 = vsyncpa [#allocation9], 1 }
0x15d8   :  { %2729 = vsyncpa [#allocation12], 1 }
0x15d9   :  { %2730 = vsyncpa [#allocation4], 1 }
0x15da   :  { %2732 = vsyncpa [#allocation4 + $0x1], 1 }
0x15db   :  { %2733 = vsyncpa [#allocation16], 1 }
0x15dc   :  { %2735 = vsyncpa [#allocation16 + $0x1], 1 }

</bundles_post_ra>
